<compile_context>
chip_gen: v7x
topology: tpu7x:2x2x1
jax: 0.10.0
libtpu: 0.0.40
codegen_flags: <defaults>
</compile_context>

<pallas_src>
import functools

import jax
import jax.numpy as jnp
from jax.experimental import pallas as pl
from jax.experimental.pallas import tpu as pltpu

_HI = jax.lax.Precision.HIGHEST


def _conv_tile_kernel(x_ref, halo_ref, taps_ref, bias_ref, o_ref, xt_ref, *,
                      wp, th, rsub):
    """3x3 conv (+ bias, ReLU) over one (batch, row-tile) block.

    x_ref    : (1, th*wp, Cin)     bf16  main rows of the padded NHWC image
    halo_ref : (1, 1, 3*wp, Cin)   bf16  the 3 padded rows below the tile
    taps_ref : (1, 9, Cin, Coutp)  bf16  SE-scaled taps, tap t = conv_w[:,:,t//3,t%3].T * scale
    bias_ref : (1, Coutp)          f32
    o_ref    : (1, th*wp, Coutp)   f32   output rows at the padded pitch wp
    xt_ref   : ((th+3)*wp, Cin)    bf16  VMEM scratch: contiguous tile incl. halo
    """
    m_main = th * wp
    # Assemble the contiguous padded tile (main rows + 3 halo rows) once so every
    # conv tap below is a single contiguous sublane slice of one buffer.
    xt_ref[pl.ds(0, m_main), :] = x_ref[0]
    xt_ref[pl.ds(m_main, 3 * wp), :] = halo_ref[0, 0]

    bias = bias_ref[...]                                   # (1, Coutp) f32

    # 3x3 conv as 9 shifted bf16 MXU matmuls, M sub-blocked (taps innermost per
    # sub-block) so the f32 accumulator stays close to vreg-resident.
    r0 = 0
    while r0 < th:                                         # static Python loop
        rows = min(rsub, th - r0)
        m0, mlen = r0 * wp, rows * wp
        acc = None
        for dy in range(3):
            for dx in range(3):
                # TODO(synk): dx = 1,2 slices start at sublane offsets 1/2 (mod 8);
                # if the bundle dump shows relayout/vld pressure, pre-roll +1/+2
                # shifted copies with pltpu.roll (XLU overlaps MXU).
                patch = xt_ref[pl.ds(m0 + dy * wp + dx, mlen), :]        # (mlen, Cin) bf16
                part = jnp.dot(patch, taps_ref[0, dy * 3 + dx],
                               preferred_element_type=jnp.float32)       # (mlen, Coutp) f32
                acc = part if acc is None else acc + part
        o_ref[0, pl.ds(m0, mlen), :] = jnp.maximum(acc + bias, 0.0)
        r0 += rows


def attention_module(high_features, low_features, fc1_w, fc2_w, conv_w, conv_b,
                     *, row_tile=None):
    """Pallas implementation of Attention_Module.forward.

    high_features : (B, Ch, H0, W0)            NCHW
    low_features  : list of (B, Cl_i, 2H0, 2W0) NCHW
    fc1_w         : (Chid, Cin)  torch Linear weight (bias-free), Chid = Cin // 16
    fc2_w         : (Cin, Chid)
    conv_w        : (Cout, Cin, 3, 3)
    conv_b        : (Cout,)
    returns       : (B, Cout, 2H0, 2W0) NCHW (matches the PyTorch module)
    """
    f32 = jnp.float32
    # ---- layout plumbing (XLA): nearest 2x upsample, channel concat ------------
    up = jnp.repeat(jnp.repeat(high_features, 2, axis=2), 2, axis=3)
    feats = jnp.concatenate([up] + list(low_features), axis=1).astype(f32)  # (B,Cin,H,W)
    B, cin, H, W = feats.shape
    cout = conv_w.shape[0]
    coutp = ((cout + 127) // 128) * 128          # lane-dense output channels
    wp = ((W + 2 + 15) // 16) * 16               # padded row pitch (>= W+2, mult of 16)

    # ---- SE branch (exact, f32, tiny) -------------------------------------------
    pooled = jnp.mean(feats, axis=(2, 3))                                    # (B, Cin)
    hmid = jnp.maximum(jnp.dot(pooled, fc1_w.T, precision=_HI), 0.0)
    scale = jax.nn.sigmoid(jnp.dot(hmid, fc2_w.T, precision=_HI))            # (B, Cin)

    # ---- row tiling --------------------------------------------------------------
    if row_tile is None:
        row_bytes = wp * cin * 2                 # one padded bf16 image row
        row_tile = max(8, min(H, (2 << 20) // max(row_bytes, 1)))
    th = max(1, min(int(row_tile), H))
    n_tiles = -(-H // th)
    Hp = n_tiles * th                            # H padded up to a multiple of th
    hp = Hp + 3                                  # 1 top pad + >=2 bottom pad rows
    rsub = max(1, min(th, 256 // wp))            # rows per accumulator sub-block

    # ---- padded channels-last bf16 feature map + halo rows ----------------------
    x = jnp.transpose(feats, (0, 2, 3, 1))                                   # (B,H,W,Cin)
    x = jnp.pad(x, ((0, 0), (1, hp - H - 1), (1, wp - W - 1), (0, 0)))
    x = x.astype(jnp.bfloat16)                                               # (B,hp,wp,Cin)
    x_main = x.reshape(B, hp * wp, cin)
    halo = jnp.stack([x[:, (t + 1) * th:(t + 1) * th + 3] for t in range(n_tiles)],
                     axis=1)                                                 # (B,nt,3,wp,Cin)
    halo = halo.reshape(B, n_tiles, 3 * wp, cin)

    # ---- SE-scaled conv taps (per batch) + padded bias, bf16 for the MXU --------
    wtaps = jnp.transpose(conv_w.astype(f32), (2, 3, 1, 0)).reshape(9, cin, cout)
    wtaps = jnp.pad(wtaps, ((0, 0), (0, 0), (0, coutp - cout)))
    taps = (wtaps[None, :, :, :] * scale[:, None, :, None]).astype(jnp.bfloat16)
    bias = jnp.pad(conv_b.astype(f32), (0, coutp - cout)).reshape(1, coutp)

    # ---- VMEM budget -> explicit limit -------------------------------------------
    main_b = th * wp * cin * 2
    halo_b = 3 * wp * cin * 2
    taps_b = 9 * cin * coutp * 2
    out_b = th * wp * coutp * 4
    scr_b = (th + 3) * wp * cin * 2
    est = 2 * (main_b + halo_b + taps_b + coutp * 4) + 2 * out_b + scr_b + (4 << 20)
    vmem_limit = int(min(100 << 20, max(est, 16 << 20)))

    kernel = functools.partial(_conv_tile_kernel, wp=wp, th=th, rsub=rsub)

    out_flat = pl.pallas_call(
        kernel,
        out_shape=jax.ShapeDtypeStruct((B, Hp * wp, coutp), f32),
        grid_spec=pltpu.PrefetchScalarGridSpec(
            num_scalar_prefetch=0,
            grid=(B, n_tiles),
            in_specs=[
                pl.BlockSpec((1, th * wp, cin), lambda b, t: (b, t, 0)),
                pl.BlockSpec((1, 1, 3 * wp, cin), lambda b, t: (b, t, 0, 0)),
                pl.BlockSpec((1, 9, cin, coutp), lambda b, t: (b, 0, 0, 0)),
                pl.BlockSpec((1, coutp), lambda b, t: (0, 0)),
            ],
            out_specs=pl.BlockSpec((1, th * wp, coutp), lambda b, t: (b, t, 0)),
            scratch_shapes=[pltpu.VMEM(((th + 3) * wp, cin), jnp.bfloat16)],
        ),
        compiler_params=pltpu.CompilerParams(
            dimension_semantics=("parallel", "parallel"),
            vmem_limit_bytes=vmem_limit),
    )(x_main, halo, taps, bias)

    # crop junk columns / padded rows / padded channels, back to NCHW
    out = out_flat.reshape(B, Hp, wp, coutp)[:, :H, :W, :cout]
    return jnp.transpose(out, (0, 3, 1, 2))


def _reference(high_features, low_features, fc1_w, fc2_w, conv_w, conv_b):
    """Pure-JAX mirror of the PyTorch module (f32, HIGHEST precision)."""
    up = jnp.repeat(jnp.repeat(high_features, 2, axis=2), 2, axis=3)
    x = jnp.concatenate([up] + list(low_features), axis=1)
    pooled = jnp.mean(x, axis=(2, 3))
    h = jnp.maximum(jnp.dot(pooled, fc1_w.T, precision=_HI), 0.0)
    a = jnp.dot(h, fc2_w.T, precision=_HI)
    scale = jax.nn.sigmoid(a)[:, :, None, None]
    xs = x * scale
    out = jax.lax.conv_general_dilated(
        xs, conv_w, window_strides=(1, 1), padding=((1, 1), (1, 1)),
        dimension_numbers=("NCHW", "OIHW", "NCHW"), precision=_HI)
    out = out + conv_b[None, :, None, None]
    return jnp.maximum(out, 0.0)


if __name__ == "__main__":
    batch = 2
    high_c, low_c = 64, 64          # in_channel = 128, ratio 16 -> hidden 8
    out_c = high_c                  # default output_channel = high_feature_channel
    h0 = w0 = 8                     # high-res feature; upsampled spatial = 16x16
    H = W = 2 * h0
    cin = high_c + low_c
    chid = cin // 16

    key = jax.random.PRNGKey(0)
    ks = jax.random.split(key, 6)
    high = jax.random.normal(ks[0], (batch, high_c, h0, w0), jnp.float32)
    low = jax.random.normal(ks[1], (batch, low_c, H, W), jnp.float32)
    fc1_w = 0.2 * jax.random.normal(ks[2], (chid, cin), jnp.float32)
    fc2_w = 0.2 * jax.random.normal(ks[3], (cin, chid), jnp.float32)
    conv_w = 0.042 * jax.random.normal(ks[4], (out_c, cin, 3, 3), jnp.float32)
    conv_b = 0.1 * jax.random.normal(ks[5], (out_c,), jnp.float32)

    # row_tile=8 -> 2 spatial tiles, exercising the halo path even at this size.
    run = jax.jit(functools.partial(attention_module, row_tile=8))
    out = jax.block_until_ready(run(high, [low], fc1_w, fc2_w, conv_w, conv_b))

    ref = _reference(high, [low], fc1_w, fc2_w, conv_w, conv_b)
    assert out.shape == (batch, out_c, H, W), out.shape
    max_err = float(jnp.max(jnp.abs(out - ref)))
    # bf16 feature map / taps on the MXU (f32 accumulate) -> loosened tolerance.
    assert jnp.allclose(out, ref, atol=3e-2, rtol=3e-2), max_err

    print("KERNEL_OK")
</pallas_src>

<mosaic_0001>
module attributes {stable_mosaic.version = 11 : i64} {
  func.func @_conv_tile_kernel(%arg0: i32, %arg1: i32, %arg2: memref<1x256x128xbf16, #tpu.memory_space<vmem>>, %arg3: memref<1x1x96x128xbf16, #tpu.memory_space<vmem>>, %arg4: memref<1x9x128x128xbf16, #tpu.memory_space<vmem>>, %arg5: memref<1x128xf32, #tpu.memory_space<vmem>>, %arg6: memref<1x256x128xf32, #tpu.memory_space<vmem>>, %arg7: memref<352x128xbf16, #tpu.memory_space<vmem>>) attributes {dimension_semantics = [#tpu.dimension_semantics<parallel>, #tpu.dimension_semantics<parallel>], iteration_bounds = array<i64: 2, 2>, scalar_prefetch = 0 : i64, scratch_operands = 1 : i64, tpu.core_type = #tpu.core_type<tc>, window_params = [{transform_indices = @transform_0, window_bounds = array<i64: 1, 256, 128>}, {transform_indices = @transform_1, window_bounds = array<i64: 1, 1, 96, 128>}, {transform_indices = @transform_2, window_bounds = array<i64: 1, 9, 128, 128>}, {pipeline_mode = #tpu.pipeline_mode<synchronous>, transform_indices = @transform_3, window_bounds = array<i64: 1, 128>}, {transform_indices = @transform_4, window_bounds = array<i64: 1, 256, 128>}]} {
    %c0 = arith.constant 0 : index
    %c0_0 = arith.constant 0 : index
    %c0_1 = arith.constant 0 : index
    %0 = vector.load %arg2[%c0, %c0_0, %c0_1] : memref<1x256x128xbf16, #tpu.memory_space<vmem>>, vector<1x256x128xbf16>
    %1 = vector.shape_cast %0 : vector<1x256x128xbf16> to vector<256x128xbf16>
    %c0_2 = arith.constant 0 : index
    %c0_3 = arith.constant 0 : index
    %2 = vector.load %arg7[%c0_2, %c0_3] : memref<352x128xbf16, #tpu.memory_space<vmem>>, vector<256x128xbf16>
    tpu.vector_store %arg7[%c0_2, %c0_3], %1 {strides = array<i32>} : memref<352x128xbf16, #tpu.memory_space<vmem>>, vector<256x128xbf16>,
    %c0_4 = arith.constant 0 : index
    %c0_5 = arith.constant 0 : index
    %c0_6 = arith.constant 0 : index
    %c0_7 = arith.constant 0 : index
    %3 = vector.load %arg3[%c0_4, %c0_5, %c0_6, %c0_7] : memref<1x1x96x128xbf16, #tpu.memory_space<vmem>>, vector<1x1x96x128xbf16>
    %4 = vector.shape_cast %3 : vector<1x1x96x128xbf16> to vector<96x128xbf16>
    %c256 = arith.constant 256 : index
    %c0_8 = arith.constant 0 : index
    %5 = vector.load %arg7[%c256, %c0_8] : memref<352x128xbf16, #tpu.memory_space<vmem>>, vector<96x128xbf16>
    tpu.vector_store %arg7[%c256, %c0_8], %4 {strides = array<i32>} : memref<352x128xbf16, #tpu.memory_space<vmem>>, vector<96x128xbf16>,
    %c0_9 = arith.constant 0 : index
    %c0_10 = arith.constant 0 : index
    %6 = vector.load %arg5[%c0_9, %c0_10] : memref<1x128xf32, #tpu.memory_space<vmem>>, vector<1x128xf32>
    %c0_11 = arith.constant 0 : index
    %c0_12 = arith.constant 0 : index
    %7 = vector.load %arg7[%c0_11, %c0_12] : memref<352x128xbf16, #tpu.memory_space<vmem>>, vector<256x128xbf16>
    %c0_13 = arith.constant 0 : index
    %c0_14 = arith.constant 0 : index
    %c0_15 = arith.constant 0 : index
    %c0_16 = arith.constant 0 : index
    %8 = vector.load %arg4[%c0_13, %c0_14, %c0_15, %c0_16] : memref<1x9x128x128xbf16, #tpu.memory_space<vmem>>, vector<1x1x128x128xbf16>
    %9 = vector.shape_cast %8 : vector<1x1x128x128xbf16> to vector<128x128xbf16>
    %cst = arith.constant dense<0.000000e+00> : vector<256x128xf32>
    %10 = tpu.matmul %7, %9, %cst {dimension_numbers = #tpu.dot_dimension_numbers<[1], [0], [0], [1], [0, 0, 1, 1], [], []>} : vector<256x128xbf16>, vector<128x128xbf16>, vector<256x128xf32> -> vector<256x128xf32>
    %c1 = arith.constant 1 : index
    %c0_17 = arith.constant 0 : index
    %11 = vector.load %arg7[%c1, %c0_17] : memref<352x128xbf16, #tpu.memory_space<vmem>>, vector<256x128xbf16>
    %c0_18 = arith.constant 0 : index
    %c1_19 = arith.constant 1 : index
    %c0_20 = arith.constant 0 : index
    %c0_21 = arith.constant 0 : index
    %12 = vector.load %arg4[%c0_18, %c1_19, %c0_20, %c0_21] : memref<1x9x128x128xbf16, #tpu.memory_space<vmem>>, vector<1x1x128x128xbf16>
    %13 = vector.shape_cast %12 : vector<1x1x128x128xbf16> to vector<128x128xbf16>
    %cst_22 = arith.constant dense<0.000000e+00> : vector<256x128xf32>
    %14 = tpu.matmul %11, %13, %cst_22 {dimension_numbers = #tpu.dot_dimension_numbers<[1], [0], [0], [1], [0, 0, 1, 1], [], []>} : vector<256x128xbf16>, vector<128x128xbf16>, vector<256x128xf32> -> vector<256x128xf32>
    %15 = arith.addf %10, %14 : vector<256x128xf32>
    %c2 = arith.constant 2 : index
    %c0_23 = arith.constant 0 : index
    %16 = vector.load %arg7[%c2, %c0_23] : memref<352x128xbf16, #tpu.memory_space<vmem>>, vector<256x128xbf16>
    %c0_24 = arith.constant 0 : index
    %c2_25 = arith.constant 2 : index
    %c0_26 = arith.constant 0 : index
    %c0_27 = arith.constant 0 : index
    %17 = vector.load %arg4[%c0_24, %c2_25, %c0_26, %c0_27] : memref<1x9x128x128xbf16, #tpu.memory_space<vmem>>, vector<1x1x128x128xbf16>
    %18 = vector.shape_cast %17 : vector<1x1x128x128xbf16> to vector<128x128xbf16>
    %cst_28 = arith.constant dense<0.000000e+00> : vector<256x128xf32>
    %19 = tpu.matmul %16, %18, %cst_28 {dimension_numbers = #tpu.dot_dimension_numbers<[1], [0], [0], [1], [0, 0, 1, 1], [], []>} : vector<256x128xbf16>, vector<128x128xbf16>, vector<256x128xf32> -> vector<256x128xf32>
    %20 = arith.addf %15, %19 : vector<256x128xf32>
    %c32 = arith.constant 32 : index
    %c0_29 = arith.constant 0 : index
    %21 = vector.load %arg7[%c32, %c0_29] : memref<352x128xbf16, #tpu.memory_space<vmem>>, vector<256x128xbf16>
    %c0_30 = arith.constant 0 : index
    %c3 = arith.constant 3 : index
    %c0_31 = arith.constant 0 : index
    %c0_32 = arith.constant 0 : index
    %22 = vector.load %arg4[%c0_30, %c3, %c0_31, %c0_32] : memref<1x9x128x128xbf16, #tpu.memory_space<vmem>>, vector<1x1x128x128xbf16>
    %23 = vector.shape_cast %22 : vector<1x1x128x128xbf16> to vector<128x128xbf16>
    %cst_33 = arith.constant dense<0.000000e+00> : vector<256x128xf32>
    %24 = tpu.matmul %21, %23, %cst_33 {dimension_numbers = #tpu.dot_dimension_numbers<[1], [0], [0], [1], [0, 0, 1, 1], [], []>} : vector<256x128xbf16>, vector<128x128xbf16>, vector<256x128xf32> -> vector<256x128xf32>
    %25 = arith.addf %20, %24 : vector<256x128xf32>
    %c33 = arith.constant 33 : index
    %c0_34 = arith.constant 0 : index
    %26 = vector.load %arg7[%c33, %c0_34] : memref<352x128xbf16, #tpu.memory_space<vmem>>, vector<256x128xbf16>
    %c0_35 = arith.constant 0 : index
    %c4 = arith.constant 4 : index
    %c0_36 = arith.constant 0 : index
    %c0_37 = arith.constant 0 : index
    %27 = vector.load %arg4[%c0_35, %c4, %c0_36, %c0_37] : memref<1x9x128x128xbf16, #tpu.memory_space<vmem>>, vector<1x1x128x128xbf16>
    %28 = vector.shape_cast %27 : vector<1x1x128x128xbf16> to vector<128x128xbf16>
    %cst_38 = arith.constant dense<0.000000e+00> : vector<256x128xf32>
    %29 = tpu.matmul %26, %28, %cst_38 {dimension_numbers = #tpu.dot_dimension_numbers<[1], [0], [0], [1], [0, 0, 1, 1], [], []>} : vector<256x128xbf16>, vector<128x128xbf16>, vector<256x128xf32> -> vector<256x128xf32>
    %30 = arith.addf %25, %29 : vector<256x128xf32>
    %c34 = arith.constant 34 : index
    %c0_39 = arith.constant 0 : index
    %31 = vector.load %arg7[%c34, %c0_39] : memref<352x128xbf16, #tpu.memory_space<vmem>>, vector<256x128xbf16>
    %c0_40 = arith.constant 0 : index
    %c5 = arith.constant 5 : index
    %c0_41 = arith.constant 0 : index
    %c0_42 = arith.constant 0 : index
    %32 = vector.load %arg4[%c0_40, %c5, %c0_41, %c0_42] : memref<1x9x128x128xbf16, #tpu.memory_space<vmem>>, vector<1x1x128x128xbf16>
    %33 = vector.shape_cast %32 : vector<1x1x128x128xbf16> to vector<128x128xbf16>
    %cst_43 = arith.constant dense<0.000000e+00> : vector<256x128xf32>
    %34 = tpu.matmul %31, %33, %cst_43 {dimension_numbers = #tpu.dot_dimension_numbers<[1], [0], [0], [1], [0, 0, 1, 1], [], []>} : vector<256x128xbf16>, vector<128x128xbf16>, vector<256x128xf32> -> vector<256x128xf32>
    %35 = arith.addf %30, %34 : vector<256x128xf32>
    %c64 = arith.constant 64 : index
    %c0_44 = arith.constant 0 : index
    %36 = vector.load %arg7[%c64, %c0_44] : memref<352x128xbf16, #tpu.memory_space<vmem>>, vector<256x128xbf16>
    %c0_45 = arith.constant 0 : index
    %c6 = arith.constant 6 : index
    %c0_46 = arith.constant 0 : index
    %c0_47 = arith.constant 0 : index
    %37 = vector.load %arg4[%c0_45, %c6, %c0_46, %c0_47] : memref<1x9x128x128xbf16, #tpu.memory_space<vmem>>, vector<1x1x128x128xbf16>
    %38 = vector.shape_cast %37 : vector<1x1x128x128xbf16> to vector<128x128xbf16>
    %cst_48 = arith.constant dense<0.000000e+00> : vector<256x128xf32>
    %39 = tpu.matmul %36, %38, %cst_48 {dimension_numbers = #tpu.dot_dimension_numbers<[1], [0], [0], [1], [0, 0, 1, 1], [], []>} : vector<256x128xbf16>, vector<128x128xbf16>, vector<256x128xf32> -> vector<256x128xf32>
    %40 = arith.addf %35, %39 : vector<256x128xf32>
    %c65 = arith.constant 65 : index
    %c0_49 = arith.constant 0 : index
    %41 = vector.load %arg7[%c65, %c0_49] : memref<352x128xbf16, #tpu.memory_space<vmem>>, vector<256x128xbf16>
    %c0_50 = arith.constant 0 : index
    %c7 = arith.constant 7 : index
    %c0_51 = arith.constant 0 : index
    %c0_52 = arith.constant 0 : index
    %42 = vector.load %arg4[%c0_50, %c7, %c0_51, %c0_52] : memref<1x9x128x128xbf16, #tpu.memory_space<vmem>>, vector<1x1x128x128xbf16>
    %43 = vector.shape_cast %42 : vector<1x1x128x128xbf16> to vector<128x128xbf16>
    %cst_53 = arith.constant dense<0.000000e+00> : vector<256x128xf32>
    %44 = tpu.matmul %41, %43, %cst_53 {dimension_numbers = #tpu.dot_dimension_numbers<[1], [0], [0], [1], [0, 0, 1, 1], [], []>} : vector<256x128xbf16>, vector<128x128xbf16>, vector<256x128xf32> -> vector<256x128xf32>
    %45 = arith.addf %40, %44 : vector<256x128xf32>
    %c66 = arith.constant 66 : index
    %c0_54 = arith.constant 0 : index
    %46 = vector.load %arg7[%c66, %c0_54] : memref<352x128xbf16, #tpu.memory_space<vmem>>, vector<256x128xbf16>
    %c0_55 = arith.constant 0 : index
    %c8 = arith.constant 8 : index
    %c0_56 = arith.constant 0 : index
    %c0_57 = arith.constant 0 : index
    %47 = vector.load %arg4[%c0_55, %c8, %c0_56, %c0_57] : memref<1x9x128x128xbf16, #tpu.memory_space<vmem>>, vector<1x1x128x128xbf16>
    %48 = vector.shape_cast %47 : vector<1x1x128x128xbf16> to vector<128x128xbf16>
    %cst_58 = arith.constant dense<0.000000e+00> : vector<256x128xf32>
    %49 = tpu.matmul %46, %48, %cst_58 {dimension_numbers = #tpu.dot_dimension_numbers<[1], [0], [0], [1], [0, 0, 1, 1], [], []>} : vector<256x128xbf16>, vector<128x128xbf16>, vector<256x128xf32> -> vector<256x128xf32>
    %50 = arith.addf %45, %49 : vector<256x128xf32>
    %51 = vector.broadcast %6 : vector<1x128xf32> to vector<256x128xf32>
    %52 = arith.addf %50, %51 : vector<256x128xf32>
    %cst_59 = arith.constant 0.000000e+00 : f32
    %53 = vector.broadcast %cst_59 : f32 to vector<256x128xf32>
    %54 = arith.maximumf %52, %53 : vector<256x128xf32>
    %c0_60 = arith.constant 0 : index
    %c0_61 = arith.constant 0 : index
    %c0_62 = arith.constant 0 : index
    %55 = vector.load %arg6[%c0_60, %c0_61, %c0_62] : memref<1x256x128xf32, #tpu.memory_space<vmem>>, vector<1x256x128xf32>
    %56 = vector.shape_cast %55 : vector<1x256x128xf32> to vector<256x128xf32>
    %57 = vector.shape_cast %54 : vector<256x128xf32> to vector<1x256x128xf32>
    tpu.vector_store %arg6[%c0_60, %c0_61, %c0_62], %57 {strides = array<i32>} : memref<1x256x128xf32, #tpu.memory_space<vmem>>, vector<1x256x128xf32>,
    return
  }
  func.func @transform_0(%arg0: i32, %arg1: i32) -> (i32, i32, i32) {
    %c0_i32 = arith.constant 0 : i32
    %c0_i32_0 = arith.constant 0 : i32
    return %arg0, %arg1, %c0_i32 : i32, i32, i32
  }
  func.func @transform_1(%arg0: i32, %arg1: i32) -> (i32, i32, i32, i32) {
    %c0_i32 = arith.constant 0 : i32
    %c0_i32_0 = arith.constant 0 : i32
    %c0_i32_1 = arith.constant 0 : i32
    return %arg0, %arg1, %c0_i32, %c0_i32_0 : i32, i32, i32, i32
  }
  func.func @transform_2(%arg0: i32, %arg1: i32) -> (i32, i32, i32, i32) {
    %c0_i32 = arith.constant 0 : i32
    %c0_i32_0 = arith.constant 0 : i32
    %c0_i32_1 = arith.constant 0 : i32
    %c0_i32_2 = arith.constant 0 : i32
    return %arg0, %c0_i32, %c0_i32_0, %c0_i32_1 : i32, i32, i32, i32
  }
  func.func @transform_3(%arg0: i32, %arg1: i32) -> (i32, i32) {
    %c0_i32 = arith.constant 0 : i32
    %c0_i32_0 = arith.constant 0 : i32
    %c0_i32_1 = arith.constant 0 : i32
    return %c0_i32, %c0_i32_0 : i32, i32
  }
  func.func @transform_4(%arg0: i32, %arg1: i32) -> (i32, i32, i32) {
    %c0_i32 = arith.constant 0 : i32
    %c0_i32_0 = arith.constant 0 : i32
    return %arg0, %arg1, %c0_i32 : i32, i32, i32
  }
}

</mosaic_0001>

<bundles_post_ra>
// kernel: attention_module.1
= control target key start
LH: loop header
LB: loop body
LE: loop exit
PB: predicated region body
PF: predicated region fallthrough
CT: control target
= control target key end

     0   :  { %s5099_s15 = smov 0   ;;  %s5101_s16 = smov 0   ;;  %s5758_s0 = inlined_call_operand.vmem [shape: bf16[2,608,128], index: 0, kind: input, shape index: {}]   ;;  %s5759_s1 = inlined_call_operand.vmem [shape: bf16[2,2,96,128], index: 1, kind: input, shape index: {}]   ;;  %s5760_s2 = inlined_call_operand.vmem [shape: bf16[2,9,128,128], index: 2, kind: input, shape index: {}]   ;;  %s5761_s3 = inlined_call_operand.vmem [shape: f32[1,128], index: 3, kind: input, shape index: {}]   ;;  %s5762_s4 = inlined_call_operand.vmem [shape: f32[2,512,128], index: 4, kind: output, shape index: {}]  }
   0x1   :  { %s5103_s17 = smov 0   ;;  %s5105_s18 = smov 0  }
   0x2   :  { %s5107_s19 = smov 0  }
   0x3 LB: > { %s23_s20 = sadd.s32 1, %s5064_s17  ;;  %s26_s21 = sadd.s32 1, %s5068_s18  ;;  %s5072_s19 = sphi %s5107_s19, %s14_s19   ;;  %s5068_s18 = sphi %s5105_s18, %s5766_s18   ;;  %s5064_s17 = sphi %s5103_s17, %s5765_s17   ;;  %s5060_s16 = sphi %s5101_s16, %s5764_s16   ;;  %s5056_s15 = sphi %s5099_s15, %s5763_s15  }
   0x4   : > { %p24_p0 = scmp.ge.s32.totalorder %s23_s20, 2  ;;  %p3727_p1 = scmp.ge.s32.totalorder %s5072_s19, 1 }
   0x5   : > { %p217_p2 = scmp.lt.s32.totalorder %s5072_s19, 5 }
   0x6   : > { %s5768_s20 = smov (%p24_p0, %s23_s20), 0  ;;  %s5770_s21 = smov (!%p24_p0, %s26_s21), %s5068_s18 }
   0x7   : > { %p218_p3 = pnand %p3727_p1, %p217_p2  ;;  %p28_p4 = scmp.ge.s32.totalorder %s5770_s21, 2 }
   0x8   : > { %p274_p5 = scmp.lt.s32.totalorder (!%p218_p3), %s5060_s16, 1  ;;  %s5134_s22 = sshll.u32 (!%p218_p3), %s5056_s15, 5  ;;  %vm561_vm0 = vsmask.f32 (!%p218_p3), 7424  ;;  %vm1163_vm1 = vcmask (!%p218_p3), 1046528  }
   0x9   : > { %s5772_s21 = smov (%p28_p4, %s5770_s21), 0  ;;  %221 = sbr.rel (%p218_p3) target bundleno = 556 (0x22c), region = 36 }
   0xa   : > { %p276_p6 = scmp.lt.s32.totalorder (!%p218_p3), %s5134_s22, 75  ;;  %p289_p7 = scmp.lt.s32.totalorder (!%p218_p3), %s5056_s15, 1 }
   0xb   : > { %p304_p8 = scmp.lt.s32.totalorder (!%p218_p3), %s5134_s22, 63 }
  0x10   : > { %s5774_s16 = smov (!%p274_p5, %s5060_s16), 1  ;;  %s5776_s15 = smov (!%p289_p7, %s5056_s15), 1 }
  0x11   : > { %s4883_s23 = smul.u32 576, %s5774_s16 }
  0x12   : > { %s277_s27 = scalar_select %p276_p6, %s5134_s22, 75 }
  0x13   : > { %s5140_s26 = scalar_lea.vmem %s5760_s2, %s4883_s23  ;;  %s4880_s28 = smul.u32 76, %s5774_s16 }
  0x14   : > { %v4924_v0 = vld [vmem:[%s5140_s26 + $0x40] sm:$0xff]   ;;  %v4926_v2 = vld [vmem:[%s5140_s26 + $0x48] sm:$0xff]   ;;  %v4928_v4 = vld [vmem:[%s5140_s26 + $0x50] sm:$0xff]   ;;  %s4882_s8 = smul.u32 24, %s5774_s16  ;;  %s5778_s22 = smov (!%p304_p8, %s5134_s22), 63 }
  0x15   : > { %v4925_v1 = vld [vmem:[%s5140_s26 + $0x100] sm:$0xff]   ;;  %4176 = vmatprep.subr.bf16.mxu1 %v4924_v0  ;;  %v4927_v3 = vld [vmem:[%s5140_s26 + $0x108] sm:$0xff]   ;;  %v4929_v5 = vld [vmem:[%s5140_s26 + $0x110] sm:$0xff]   ;;  %s279_s29 = sadd.s32 %s4880_s28, %s277_s27  ;;  %s4881_s9 = smul.u32 12, %s5776_s15 }
  0x16   : > { %4368 = vmatprep.subr.bf16.mxu0 %v4925_v1  ;;  %4177 = vmatpush3.bf16.msra.mxu1 %v4924_v0  ;;  %v4930_v6 = vld [vmem:[%s5140_s26 + $0x58] sm:$0xff]   ;;  %s3729_s30 = sshll.u32 %s279_s29, 2  ;;  %v4932_v8 = vld [vmem:[%s5140_s26 + $0x60] sm:$0xff]   ;;  %v4934_v10 = vld [vmem:[%s5140_s26 + $0x68] sm:$0xff]   ;;  %s3733_s15 = sshll.u32 %s5774_s16, 6 }
  0x17   : > { %4369 = vmatpush3.bf16.msra.mxu0 %v4925_v1  ;;  %4178 = vmatprep.subr.bf16.mxu1 %v4926_v2  ;;  %v4931_v7 = vld [vmem:[%s5140_s26 + $0x118] sm:$0xff]   ;;  %v4933_v9 = vld [vmem:[%s5140_s26 + $0x120] sm:$0xff]   ;;  %s5159_s7 = scalar_lea.vmem %s5758_s0, %s3729_s30  ;;  %v4935_v11 = vld [vmem:[%s5140_s26 + $0x128] sm:$0xff]   ;;  %s5253_s10 = sadd.s32 %s4882_s8, %s4881_s9 }
  0x18   : > { %4370 = vmatprep.subr.bf16.mxu0 %v4927_v3  ;;  %v5163_v12 = vld [vmem:[%s5159_s7] sm:$0xff]   ;;  %v5166_v13 = vld [vmem:[%s5159_s7 + $0x8] sm:$0xff]   ;;  %v4936_v14 = vld [vmem:[%s5140_s26 + $0x70] sm:$0xff]   ;;  %s3730_s11 = sshll.u32 %s5253_s10, 2  ;;  %s307_s23 = sadd.s32 %s3733_s15, %s5778_s22 }
  0x19   : > { %440 = vst [vmem:[#allocation2] sm:$0xff] %v5163_v12  ;;  %441 = vst [vmem:[#allocation2 + $0x8] sm:$0xff] %v5166_v13  ;;  %v563_v15 = vshrl.u32 %v5163_v12, 16  ;;  %v565_v16 = vshll.u32 %v5163_v12, 16  ;;  %v570_v17 = vshll.u32 %v5166_v13, 16  ;;  %v5175_v18 = vld [vmem:[%s5159_s7 + $0x10] sm:$0xff]   ;;  %s5284_s14 = scalar_lea.vmem %s5759_s1, %s3730_s11 }
  0x1a   : > { %4179 = vmatpush3.bf16.msra.mxu1 %v4926_v2  ;;  %v5178_v19 = vld [vmem:[%s5159_s7 + $0x18] sm:$0xff]   ;;  %v4937_v20 = vld [vmem:[%s5140_s26 + $0x130] sm:$0xff]   ;;  %442 = vst [vmem:[#allocation2 + $0x10] sm:$0xff] %v5175_v18  ;;  %v1763_v23 = vshrl.u32 %v5175_v18, 16  ;;  %v1765_v24 = vshll.u32 %v5175_v18, 16  ;;  %v5185_v25 = vld [vmem:[%s5159_s7 + $0x20] sm:$0xff]  }
  0x1b   : > { %4371 = vmatpush3.bf16.msra.mxu0 %v4927_v3  ;;  %4180 = vmatprep.subr.bf16.mxu1 %v4928_v4  ;;  %v567_v21 = vrot.slane %v565_v16, 1  ;;  %v572_v22 = vrot.slane %v570_v17, 1  ;;  %v4938_v26 = vld [vmem:[%s5140_s26 + $0x78] sm:$0xff]   ;;  %443 = vst [vmem:[#allocation2 + $0x18] sm:$0xff] %v5178_v19  ;;  %v1770_v27 = vshll.u32 %v5178_v19, 16  ;;  %v574_v28 = vshrl.u32 %v5166_v13, 16 }
  0x1c   : > { %4372 = vmatprep.subr.bf16.mxu0 %v4929_v5  ;;  %v1767_v30 = vrot.slane %v1765_v24, 1  ;;  %444 = vst [vmem:[#allocation2 + $0x20] sm:$0xff] %v5185_v25  ;;  %v1778_v31 = vshll.u32 %v5185_v25, 16  ;;  %v1774_v33 = vshrl.u32 %v5178_v19, 16  ;;  %v4939_v34 = vld [vmem:[%s5140_s26 + $0x138] sm:$0xff]   ;;  %v5197_v37 = vld [vmem:[%s5159_s7 + $0x28] sm:$0xff]  }
  0x1d   : > { %v568_v29 = vor.u32 %v567_v21, %v563_v15  ;;  %v1772_v32 = vrot.slane %v1770_v27, 1  ;;  %v1782_v38 = vshrl.u32 %v5185_v25, 16  ;;  %v576_v40 = vor.u32 %v574_v28, %v572_v22  ;;  %v4944_v41 = vld [vmem:[%s5140_s26] sm:$0xff]   ;;  %445 = vst [vmem:[#allocation2 + $0x28] sm:$0xff] %v5197_v37  ;;  %v5205_v45 = vld [vmem:[%s5159_s7 + $0x30] sm:$0xff]   ;;  %v5210_v49 = vld [vmem:[%s5159_s7 + $0x38] sm:$0xff]  }
  0x1e   : > { %4181 = vmatpush3.bf16.msra.mxu1 %v4928_v4  ;;  %v1768_v36 = vor.u32 %v1767_v30, %v1763_v23  ;;  %v1780_v42 = vrot.slane %v1778_v31, 1  ;;  %v1786_v44 = vshll.u32 %v5197_v37, 16  ;;  %v4946_v46 = vld [vmem:[%s5140_s26 + $0x140] sm:$0xff]   ;;  %446 = vst [vmem:[#allocation2 + $0x30] sm:$0xff] %v5205_v45  ;;  %v4947_v51 = vld [vmem:[%s5140_s26 + $0x148] sm:$0xff]   ;;  %v1794_v52 = vshll.u32 %v5205_v45, 16 }
  0x1f   : > { %4373 = vmatpush3.bf16.msra.mxu0 %v4929_v5  ;;  %4182 = vmatprep.subr.bf16.mxu1 %v4930_v6  ;;  %v573_v35 = vsel %vm561_vm0, %v568_v29, %v572_v22  ;;  %v1776_v43 = vor.u32 %v1774_v33, %v1772_v32  ;;  %v581_v50 = vsel %vm561_vm0, %v576_v40, %v1767_v30  ;;  %v1790_v54 = vshrl.u32 %v5197_v37, 16  ;;  %v5222_v57 = vld [vmem:[%s5159_s7 + $0x40] sm:$0xff]   ;;  %v4949_v59 = vld [vmem:[%s5140_s26 + $0x8] sm:$0xff]   ;;  %v4954_v61 = vld [vmem:[%s5140_s26 + $0x10] sm:$0xff]  }
  0x20   : > { %4374 = vmatprep.subr.bf16.mxu0 %v4931_v7  ;;  %4192 = vmatprep.mubr.bf16.mxu1 %v573_v35  ;;  %v1773_v39 = vsel %vm561_vm0, %v1768_v36, %v1772_v32  ;;  %v1784_v47 = vor.u32 %v1782_v38, %v1780_v42  ;;  %v1788_v48 = vrot.slane %v1786_v44, 1  ;;  %447 = vst [vmem:[#allocation2 + $0x38] sm:$0xff] %v5210_v49  ;;  %v1798_v55 = vshrl.u32 %v5205_v45, 16  ;;  %v5234_v63 = vld [vmem:[%s5159_s7 + $0x48] sm:$0xff]   ;;  %v4951_v0 = vld [vmem:[%s5140_s26 + $0x150] sm:$0xff]   ;;  %v4956_v15 = vld [vmem:[%s5140_s26 + $0x160] sm:$0xff]  }
  0x21   : > { %4384 = vmatprep.mubr.bf16.mxu0 %v1773_v39  ;;  %v1781_v53 = vsel %vm561_vm0, %v1776_v43, %v1780_v42  ;;  %v1802_v56 = vshll.u32 %v5210_v49, 16  ;;  %v1796_v60 = vrot.slane %v1794_v52, 1  ;;  %448 = vst [vmem:[#allocation2 + $0x40] sm:$0xff] %v5222_v57  ;;  %v1810_v3 = vshll.u32 %v5222_v57, 16  ;;  %449 = vst [vmem:[#allocation2 + $0x48] sm:$0xff] %v5234_v63  ;;  %v5241_v4 = vld [vmem:[%s5159_s7 + $0x50] sm:$0xff]  }
  0x22   : > { %4183 = vmatpush3.bf16.msra.mxu1 %v4930_v6  ;;  %v1789_v58 = vsel %vm561_vm0, %v1784_v47, %v1788_v48  ;;  %v1792_v62 = vor.u32 %v1790_v54, %v1788_v48  ;;  %v1806_v6 = vshrl.u32 %v5210_v49, 16  ;;  %450 = vst [vmem:[#allocation2 + $0x50] sm:$0xff] %v5241_v4  ;;  %v5261_v21 = vld [vmem:[%s5159_s7 + $0x60] sm:$0xff]   ;;  %v4957_v24 = vld [vmem:[%s5140_s26 + $0x168] sm:$0xff]   ;;  %v1826_v28 = vshll.u32 %v5241_v4, 16  ;;  %v5277_v32 = vld [vmem:[%s5159_s7 + $0x70] sm:$0xff]  }
  0x23   : > { %4375 = vmatpush3.bf16.msra.mxu0 %v4931_v7  ;;  %4184 = vmatprep.subr.bf16.mxu1 %v4932_v8  ;;  %v1800_v1 = vor.u32 %v1798_v55, %v1796_v60  ;;  %v1804_v2 = vrot.slane %v1802_v56, 1  ;;  %v1818_v7 = vshll.u32 %v5234_v63, 16  ;;  %v4963_v23 = vld [vmem:[%s5140_s26 + $0x20] sm:$0xff]   ;;  %452 = vst [vmem:[#allocation2 + $0x60] sm:$0xff] %v5261_v21  ;;  %v2151_v29 = vld [vmem:[#allocation2 + $0x10] sm:$0xfe] }
  0x24   : > { %4376 = vmatprep.subr.bf16.mxu0 %v4933_v9  ;;  %v1797_v5 = vsel %vm561_vm0, %v1792_v62, %v1796_v60  ;;  %v5272_v30 = vld [vmem:[%s5159_s7 + $0x68] sm:$0xff]   ;;  %454 = vst [vmem:[#allocation2 + $0x70] sm:$0xff] %v5277_v32  ;;  %v5289_v36 = vrot.slane %v1826_v28, 1  ;;  %v5292_v38 = vld [vmem:[%s5159_s7 + $0x78] sm:$0xff]   ;;  %v5295_v40 = vrot.slane %v5178_v19, 1  ;;  %v5299_v42 = vld [vmem:[%s5284_s14] sm:$0xff]  }
  0x25   : > { %v1808_v16 = vor.u32 %v1806_v6, %v1804_v2  ;;  %v5255_v17 = vrot.slane %v1818_v7, 1  ;;  %v4967_v33 = vld [vmem:[%s5140_s26 + $0x28] sm:$0xff]   ;;  %453 = vst [vmem:[#allocation2 + $0x68] sm:$0xff] %v5272_v30  ;;  %455 = vst [vmem:[#allocation2 + $0x78] sm:$0xff] %v5292_v38  ;;  %v646_v44 = vshrl.u32 %v5241_v4, 16  ;;  %v4962_v47 = vld [vmem:[%s5140_s26 + $0x178] sm:$0xff]  }
  0x26   : > { %4185 = vmatpush3.bf16.msra.mxu1 %v4932_v8  ;;  %v4952_v8 = vld [vmem:[%s5140_s26 + $0x158] sm:$0xff]   ;;  %504 = vst [vmem:[#allocation2 + $0x80] sm:$0xff] %v5299_v42  ;;  %v4964_v54 = vld [vmem:[%s5140_s26 + $0x180] sm:$0xff]   ;;  %v2191_v55 = vrot.slane %v5197_v37, 1  ;;  %v658_v56 = vshll.u32 %v5261_v21, 16  ;;  %v4968_v60 = vld [vmem:[%s5140_s26 + $0x188] sm:$0xff]  }
  0x27   : > { %4377 = vmatpush3.bf16.msra.mxu0 %v4933_v9  ;;  %4186 = vmatprep.subr.bf16.mxu1 %v4934_v10  ;;  %v1805_v9 = vsel %vm561_vm0, %v1800_v1, %v1804_v2  ;;  %v648_v52 = vor.u32 %v5289_v36, %v646_v44  ;;  %v666_v62 = vshll.u32 %v5272_v30, 16  ;;  %v5344_v7 = vld [vmem:[%s5284_s14 + $0x10] sm:$0xff]   ;;  %v2199_v44 = vrot.slane %v5234_v63, 1 }
  0x28   : > { %4378 = vmatprep.subr.bf16.mxu0 %v4935_v11  ;;  %506 = vst [vmem:[#allocation2 + $0x90] sm:$0xff] %v5344_v7 }
  0x2a   : > { %4187 = vmatpush3.bf16.msra.mxu1 %v4934_v10  ;;  %v1814_v10 = vshrl.u32 %v5222_v57, 16 }
  0x2b   : > { %4379 = vmatpush3.bf16.msra.mxu0 %v4935_v11  ;;  %4188 = vmatprep.subr.bf16.mxu1 %v4936_v14  ;;  %v4959_v11 = vld [vmem:[%s5140_s26 + $0x18] sm:$0xff]  }
  0x2c   : > { %4380 = vmatprep.subr.bf16.mxu0 %v4937_v20 }
  0x2e   : > { %4189 = vmatpush3.bf16.msra.mxu1 %v4936_v14  ;;  %v1812_v14 = vrot.slane %v1810_v3, 1  ;;  %v5337_v3 = vld [vmem:[%s5284_s14 + $0x8] sm:$0xff]  }
  0x2f   : > { %4381 = vmatpush3.bf16.msra.mxu0 %v4937_v20  ;;  %4190 = vmatprep.subr.bf16.mxu1 %v4938_v26  ;;  %v5258_v20 = vld [vmem:[%s5159_s7 + $0x58] sm:$0xff]  }
  0x30   : > { %4382 = vmatprep.subr.bf16.mxu0 %v4939_v34  ;;  %v1816_v22 = vor.u32 %v1814_v10, %v1812_v14  ;;  %451 = vst [vmem:[#allocation2 + $0x58] sm:$0xff] %v5258_v20  ;;  %v1813_v27 = vsel %vm561_vm0, %v1808_v16, %v1812_v14  ;;  %v668_v10 = vrot.slane %v666_v62, 1  ;;  %v4972_v14 = vld [vmem:[%s5140_s26 + $0x190] sm:$0xff]  }
  0x32   : > { %4191 = vmatpush3.bf16.msra.mxu1 %v4938_v26  ;;  %v1822_v26 = vshrl.u32 %v5234_v63, 16  ;;  %v1821_v31 = vsel %vm561_vm0, %v1816_v22, %v5255_v17  ;;  %v670_v22 = vshrl.u32 %v5272_v30, 16 }
  0x33   : > { %4383 = vmatpush3.bf16.msra.mxu0 %v4939_v34  ;;  %4224 = vmatprep.subr.bf16.mxu1 %v4944_v41  ;;  %v4961_v34 = vld [vmem:[%s5140_s26 + $0x170] sm:$0xff]  }
  0x34   : > { %4416 = vmatprep.subr.bf16.mxu0 %v4946_v46  ;;  %v1824_v35 = vor.u32 %v1822_v26, %v5255_v17  ;;  %v678_v26 = vshrl.u32 %v5277_v32, 16 }
  0x35   : > { %4193 = vmatmul.mubr.bf16.vlgmr.msra.gmra.mrb[0].mxu1 %v581_v50  ;;  %v4976_v50 = vld [vmem:[%s5140_s26 + $0x38] sm:$0xff]  }
  0x36   : > { %4385 = vmatmul.mubr.bf16.vlgmr.msra.gmra.mrb[0].mxu0 %v1781_v53  ;;  %4225 = vmatpush3.bf16.msra.mxu1 %v4944_v41  ;;  %v4971_v41 = vld [vmem:[%s5140_s26 + $0x30] sm:$0xff]   ;;  %v5305_v43 = vsel %vm561_vm0, %v1824_v35, %v5289_v36 }
  0x37   : > { %4417 = vmatpush3.bf16.msra.mxu0 %v4946_v46  ;;  %4196 = vmatprep.mubr.bf16.mxu1 %v1773_v39  ;;  %v2186_v39 = vrot.slane %v2151_v29, 1  ;;  %v650_v46 = vshll.u32 %v5258_v20, 16  ;;  %v4977_v29 = vld [vmem:[%s5140_s26 + $0x198] sm:$0xff]  }
  0x38   : > { %4418 = vmatprep.subr.bf16.mxu0 %v4947_v51  ;;  %4388 = vmatprep.mubr.bf16.mxu0 %v1789_v58 }
  0x39   : > { %4226 = vmatprep.subr.bf16.mxu1 %v4949_v59  ;;  %v2188_v48 = vsel %vm1163_vm1, %v2186_v39, %v5295_v40 }
  0x3a   : > { %4227 = vmatpush3.bf16.msra.mxu1 %v4949_v59  ;;  %v654_v59 = vshrl.u32 %v5258_v20, 16 }
  0x3b   : > { %4419 = vmatpush3.bf16.msra.mxu0 %v4947_v51  ;;  %4228 = vmatprep.subr.bf16.mxu1 %v4954_v61  ;;  %v2189_v51 = vrot.slane %v5185_v25, 1 }
  0x3c   : > { %4420 = vmatprep.subr.bf16.mxu0 %v4951_v0 }
  0x3d   : > { %4197 = vmatmul.mubr.bf16.gmra.mrb[4].mxu1 %v1781_v53  ;;  %v652_v53 = vrot.slane %v650_v46, 1  ;;  %v5334_v2 = vsel %vm1163_vm1, %v2189_v51, %v2191_v55  ;;  %v4979_v46 = vld [vmem:[%s5140_s26 + $0x1a0] sm:$0xff]  }
  0x3e   : > { %4389 = vmatmul.mubr.bf16.gmra.mrb[4].mxu0 %v1797_v5  ;;  %4200 = vmatprep.mubr.bf16.mxu1 %v1789_v58  ;;  %v5320_v58 = vld [vmem:[%s5140_s26 + $0x80] sm:$0xff]  }
  0x3f   : > { %4421 = vmatpush3.bf16.msra.mxu0 %v4951_v0  ;;  %4392 = vmatprep.mubr.bf16.mxu0 %v1805_v9  ;;  %v5328_v0 = vsel %vm1163_vm1, %v5295_v40, %v2189_v51  ;;  %v5331_v1 = vsel %vm561_vm0, %v648_v52, %v652_v53  ;;  %v656_v6 = vor.u32 %v654_v59, %v652_v53 }
  0x40   : > { %4422 = vmatprep.subr.bf16.mxu0 %v4952_v8  ;;  %4229 = vmatpush3.bf16.msra.mxu1 %v4954_v61  ;;  %v662_v61 = vshrl.u32 %v5261_v21, 16 }
  0x41   : > { %4230 = vmatprep.subr.bf16.mxu1 %v4959_v11 }
  0x43   : > { %4423 = vmatpush3.bf16.msra.mxu0 %v4952_v8  ;;  %v2193_v8 = vrot.slane %v5205_v45, 1 }
  0x44   : > { %4424 = vmatprep.subr.bf16.mxu0 %v4956_v15  ;;  %4231 = vmatpush3.bf16.msra.mxu1 %v4959_v11  ;;  %v2195_v11 = vrot.slane %v5210_v49, 1 }
  0x45   : > { %4201 = vmatmul.mubr.bf16.gmra.mrb[8].mxu1 %v1797_v5  ;;  %4232 = vmatprep.subr.bf16.mxu1 %v4963_v23  ;;  %v660_v5 = vrot.slane %v658_v56, 1 }
  0x46   : > { %4393 = vmatmul.mubr.bf16.gmra.mrb[8].mxu0 %v1813_v27  ;;  %4204 = vmatprep.mubr.bf16.mxu1 %v1805_v9  ;;  %v5365_v28 = vsel %vm1163_vm1, %v2193_v8, %v2195_v11 }
  0x47   : > { %4425 = vmatpush3.bf16.msra.mxu0 %v4956_v15  ;;  %4396 = vmatprep.mubr.bf16.mxu0 %v1821_v31  ;;  %v664_v9 = vor.u32 %v662_v61, %v660_v5  ;;  %v674_v15 = vshll.u32 %v5277_v32, 16  ;;  %v5353_v16 = vsel %vm561_vm0, %v656_v6, %v660_v5  ;;  %v4983_v61 = vld [vmem:[%s5140_s26 + $0x1b0] sm:$0xff]   ;;  %v2203_v5 = vrot.slane %v5258_v20, 1  ;;  %v5402_v6 = vld [vmem:[%s5284_s14 + $0x18] sm:$0xff]  }
  0x48   : > { %4426 = vmatprep.subr.bf16.mxu0 %v4957_v24  ;;  %4233 = vmatpush3.bf16.msra.mxu1 %v4963_v23  ;;  %v5357_v23 = vsel %vm1163_vm1, %v2191_v55, %v2193_v8  ;;  %v5391_v55 = vrot.slane %v5241_v4, 1 }
  0x49   : > { %4234 = vmatprep.subr.bf16.mxu1 %v4967_v33 }
  0x4b   : > { %4427 = vmatpush3.bf16.msra.mxu0 %v4957_v24  ;;  %v5360_v24 = vsel %vm561_vm0, %v664_v9, %v668_v10 }
  0x4c   : > { %4428 = vmatprep.subr.bf16.mxu0 %v4961_v34  ;;  %4235 = vmatpush3.bf16.msra.mxu1 %v4967_v33  ;;  %v672_v33 = vor.u32 %v670_v22, %v668_v10  ;;  %v5411_v10 = vsel %vm1163_vm1, %v2199_v44, %v5391_v55  ;;  %v2207_v22 = vrot.slane %v5272_v30, 1 }
  0x4d   : > { %4205 = vmatmul.mubr.bf16.gmra.mrb[12].mxu1 %v1813_v27  ;;  %4236 = vmatprep.subr.bf16.mxu1 %v4971_v41  ;;  %v682_v27 = vshll.u32 %v5292_v38, 16 }
  0x4e   : > { %4397 = vmatmul.mubr.bf16.gmra.mrb[12].mxu0 %v5305_v43  ;;  %4208 = vmatprep.mubr.bf16.mxu1 %v1821_v31  ;;  %v676_v31 = vrot.slane %v674_v15, 1  ;;  %v2205_v15 = vrot.slane %v5261_v21, 1 }
  0x4f   : > { %4429 = vmatpush3.bf16.msra.mxu0 %v4961_v34  ;;  %4432 = vmatprep.mubr.bf16.mxu0 %v2188_v48  ;;  %v2197_v34 = vrot.slane %v5222_v57, 1  ;;  %v684_v39 = vrot.slane %v682_v27, 1  ;;  %v686_v48 = vshrl.u32 %v5292_v38, 16 }
  0x50   : > { %4430 = vmatprep.subr.bf16.mxu0 %v4962_v47  ;;  %4237 = vmatpush3.bf16.msra.mxu1 %v4971_v41  ;;  %v680_v35 = vor.u32 %v678_v26, %v676_v31  ;;  %v543_v41 = vld [vmem:[#allocation2 + $0x80] sm:$0x1]  ;;  %v5425_v27 = vsel %vm1163_vm1, %v2203_v5, %v2205_v15 }
  0x51   : > { %4238 = vmatprep.subr.bf16.mxu1 %v4976_v50  ;;  %v5380_v51 = vsel %vm1163_vm1, %v2195_v11, %v2197_v34  ;;  %v5386_v53 = vsel %vm1163_vm1, %v2197_v34, %v2199_v44  ;;  %v5395_v56 = vor.u32 %v686_v48, %v684_v39  ;;  %v1195_v62 = vrot.slane %v543_v41, 1  ;;  %v4989_v26 = vld [vmem:[%s5140_s26 + $0x1c0] sm:$0xff]   ;;  %v5462_v48 = vld [vmem:[#allocation2 + $0x90] sm:$0x1] }
  0x52   : > { %v5383_v52 = vsel %vm561_vm0, %v680_v35, %v684_v39  ;;  %v5415_v11 = vsel %vm1163_vm1, %v5391_v55, %v2203_v5  ;;  %v4985_v35 = vld [vmem:[%s5140_s26 + $0x98] sm:$0xff]   ;;  %v5016_v39 = vld [vmem:[%s5284_s14 + $0x20] sm:$0xff]   ;;  %v4991_v5 = vld [vmem:[%s5140_s26 + $0x1c8] sm:$0xff]  }
  0x53   : > { %4431 = vmatpush3.bf16.msra.mxu0 %v4962_v47  ;;  %v5376_v47 = vsel %vm561_vm0, %v672_v33, %v676_v31  ;;  %v4980_v31 = vld [vmem:[%s5140_s26 + $0x88] sm:$0xff]   ;;  %v4982_v33 = vld [vmem:[%s5140_s26 + $0x90] sm:$0xff]   ;;  %v4988_v44 = vld [vmem:[%s5140_s26 + $0xa0] sm:$0xff]   ;;  %508 = vst [vmem:[#allocation2 + $0xa0] sm:$0xff] %v5016_v39 }
  0x54   : > { %4464 = vmatprep.subr.bf16.mxu0 %v4964_v54  ;;  %4239 = vmatpush3.bf16.msra.mxu1 %v4976_v50  ;;  %v690_v50 = vshll.u32 %v543_v41, 16  ;;  %v5452_v41 = vrot.slane %v5337_v3, 1 }
  0x55   : > { %4209 = vmatmul.mubr.bf16.gmra.mrb[16].mxu1 %v5305_v43  ;;  %4272 = vmatprep.subr.bf16.mxu1 %v5320_v58 }
  0x56   : > { %4433 = vmatmul.mubr.bf16.vlgmr.msra.gmra.mrb[0].mxu0 %v5328_v0  ;;  %4212 = vmatprep.mubr.bf16.mxu1 %v5331_v1  ;;  %v692_v59 = vrot.slane %v690_v50, 1  ;;  %v4990_v50 = vld [vmem:[%s5140_s26 + $0xa8] sm:$0xff]  }
  0x57   : > { %4465 = vmatpush3.bf16.msra.mxu0 %v4964_v54  ;;  %4436 = vmatprep.mubr.bf16.mxu0 %v5334_v2  ;;  %v4981_v54 = vld [vmem:[%s5140_s26 + $0x1a8] sm:$0xff]  }
  0x58   : > { %4466 = vmatprep.subr.bf16.mxu0 %v4968_v60  ;;  %v693_v9 = vsel %vm561_vm0, %v5395_v56, %v692_v59  ;;  %v4992_v59 = vld [vmem:[%s5140_s26 + $0xb0] sm:$0xff]  }
  0x5b   : > { %4467 = vmatpush3.bf16.msra.mxu0 %v4968_v60  ;;  %v2211_v60 = vrot.slane %v5292_v38, 1 }
  0x5c   : > { %4468 = vmatprep.subr.bf16.mxu0 %v4972_v14 }
  0x5d   : > { %4213 = vmatmul.mubr.bf16.gmra.mrb[20].mxu1 %v5353_v16  ;;  %v5405_v8 = vsel %vm1163_vm1, %v2211_v60, %v1195_v62  ;;  %v4996_v62 = vld [vmem:[%s5140_s26 + $0xc0] sm:$0xff]  }
  0x5e   : > { %4437 = vmatmul.mubr.bf16.gmra.mrb[4].mxu0 %v5357_v23  ;;  %4216 = vmatprep.mubr.bf16.mxu1 %v5360_v24 }
  0x5f   : > { %4440 = vmatprep.mubr.bf16.mxu0 %v5365_v28  ;;  %4469 = vmatpush3.bf16.msra.mxu0 %v4972_v14  ;;  %v4987_v14 = vld [vmem:[%s5140_s26 + $0x1b8] sm:$0xff]  }
  0x60   : > { %4470 = vmatprep.subr.bf16.mxu0 %v4977_v29 }
  0x63   : > { %4471 = vmatpush3.bf16.msra.mxu0 %v4977_v29  ;;  %v5428_v29 = vsel %vm1163_vm1, %v2205_v15, %v2207_v22  ;;  %v5018_v15 = vld [vmem:[#allocation2 + $0x8] sm:$0xff] }
  0x64   : > { %4472 = vmatprep.subr.bf16.mxu0 %v4979_v46 }
  0x65   : > { %4217 = vmatmul.mubr.bf16.gmra.mrb[24].mxu1 %v5376_v47 }
  0x66   : > { %4441 = vmatmul.mubr.bf16.gmra.mrb[8].mxu0 %v5380_v51  ;;  %4220 = vmatprep.mubr.bf16.mxu1 %v5383_v52 }
  0x67   : > { %4444 = vmatprep.mubr.bf16.mxu0 %v5386_v53  ;;  %4473 = vmatpush3.bf16.msra.mxu0 %v4979_v46 }
  0x68   : > { %4474 = vmatprep.subr.bf16.mxu0 %v4981_v54 }
  0x6b   : > { %4475 = vmatpush3.bf16.msra.mxu0 %v4981_v54  ;;  %v2217_v54 = vrot.slane %v5462_v48, 1 }
  0x6c   : > { %4476 = vmatprep.subr.bf16.mxu0 %v4983_v61 }
  0x6d   : > { %4221 = vmatmul.mubr.bf16.gmra.mrb[28].mxu1 %v693_v9  ;;  %v4995_v9 = vld [vmem:[%s5140_s26 + $0x1d8] sm:$0xff]  }
  0x6e   : > { %4445 = vmatmul.mubr.bf16.gmra.mrb[12].mxu0 %v5411_v10  ;;  %4240 = vmatprep.mubr.bf16.mxu1 %v5163_v12  ;;  %v2209_v12 = vrot.slane %v5277_v32, 1 }
  0x6f   : > { %4448 = vmatprep.mubr.bf16.mxu0 %v5415_v11  ;;  %4477 = vmatpush3.bf16.msra.mxu0 %v4983_v61  ;;  %v4994_v61 = vld [vmem:[%s5140_s26 + $0xb8] sm:$0xff]  }
  0x70   : > { %4478 = vmatprep.subr.bf16.mxu0 %v4987_v14  ;;  %v5439_v34 = vsel %vm1163_vm1, %v2207_v22, %v2209_v12  ;;  %v5001_v22 = vld [vmem:[%s5140_s26 + $0x1f0] sm:$0xff]  }
  0x73   : > { %4479 = vmatpush3.bf16.msra.mxu0 %v4987_v14  ;;  %v4999_v14 = vld [vmem:[%s5140_s26 + $0x1e8] sm:$0xff]  }
  0x74   : > { %4512 = vmatprep.subr.bf16.mxu0 %v4989_v26 }
  0x75   : > { %4241 = vmatmul.mubr.bf16.vlgmr.msra.gmra.mrb[0].mxu1 %v5166_v13  ;;  %v5442_v13 = vsel %vm1163_vm1, %v2209_v12, %v2211_v60 }
  0x76   : > { %4449 = vmatmul.mubr.bf16.gmra.mrb[16].mxu0 %v5425_v27  ;;  %4273 = vmatpush3.bf16.msra.mxu1 %v5320_v58  ;;  %v2213_v58 = vrot.slane %v5299_v42, 1 }
  0x77   : > { %4244 = vmatprep.mubr.bf16.mxu1 %v5175_v18  ;;  %4452 = vmatprep.mubr.bf16.mxu0 %v5428_v29 }
  0x78   : > { %4274 = vmatprep.subr.bf16.mxu1 %v4980_v31  ;;  %v5460_v46 = vsel %vm1163_vm1, %v2213_v58, %v5452_v41 }
  0x7a   : > { %4275 = vmatpush3.bf16.msra.mxu1 %v4980_v31  ;;  %v5004_v31 = vld [vmem:[%s5140_s26 + $0x1f8] sm:$0xff]  }
  0x7b   : > { %4276 = vmatprep.subr.bf16.mxu1 %v4982_v33 }
  0x7d   : > { %4245 = vmatmul.mubr.bf16.gmra.mrb[4].mxu1 %v5178_v19  ;;  %v5456_v19 = vsel %vm1163_vm1, %v2211_v60, %v2213_v58  ;;  %v2218_v60 = vsel %vm1163_vm1, %v5452_v41, %v2217_v54  ;;  %v5009_v54 = vld [vmem:[%s5140_s26 + $0xf0] sm:$0xff]  }
  0x7e   : > { %4453 = vmatmul.mubr.bf16.gmra.mrb[20].mxu0 %v5439_v34  ;;  %4248 = vmatprep.mubr.bf16.mxu1 %v5185_v25 }
  0x7f   : > { %4456 = vmatprep.mubr.bf16.mxu0 %v5442_v13  ;;  %4277 = vmatpush3.bf16.msra.mxu1 %v4982_v33 }
  0x80   : > { %4278 = vmatprep.subr.bf16.mxu1 %v4985_v35 }
  0x83   : > { %4279 = vmatpush3.bf16.msra.mxu1 %v4985_v35  ;;  %v4998_v35 = vld [vmem:[%s5140_s26 + $0xc8] sm:$0xff]  }
  0x84   : > { %4280 = vmatprep.subr.bf16.mxu1 %v4988_v44 }
  0x85   : > { %4249 = vmatmul.mubr.bf16.gmra.mrb[8].mxu1 %v5197_v37 }
  0x86   : > { %4457 = vmatmul.mubr.bf16.gmra.mrb[24].mxu0 %v5456_v19  ;;  %4252 = vmatprep.mubr.bf16.mxu1 %v5205_v45 }
  0x87   : > { %4460 = vmatprep.mubr.bf16.mxu0 %v5460_v46  ;;  %4281 = vmatpush3.bf16.msra.mxu1 %v4988_v44 }
  0x88   : > { %4282 = vmatprep.subr.bf16.mxu1 %v4990_v50 }
  0x8b   : > { %4283 = vmatpush3.bf16.msra.mxu1 %v4990_v50 }
  0x8c   : > { %4284 = vmatprep.subr.bf16.mxu1 %v4992_v59 }
  0x8d   : > { %4253 = vmatmul.mubr.bf16.gmra.mrb[12].mxu1 %v5210_v49 }
  0x8e   : > { %4461 = vmatmul.mubr.bf16.gmra.mrb[28].mxu0 %v2218_v60  ;;  %4256 = vmatprep.mubr.bf16.mxu1 %v5222_v57 }
  0x8f   : > { %4480 = vmatprep.mubr.bf16.mxu0 %v5185_v25  ;;  %4285 = vmatpush3.bf16.msra.mxu1 %v4992_v59  ;;  %v4993_v25 = vld [vmem:[%s5140_s26 + $0x1d0] sm:$0xff]   ;;  %v5534_v59 = vld [vmem:[#allocation2 + $0x38] sm:$0xff] }
  0x90   : > { %4286 = vmatprep.subr.bf16.mxu1 %v4994_v61 }
  0x93   : > { %4287 = vmatpush3.bf16.msra.mxu1 %v4994_v61 }
  0x94   : > { %4320 = vmatprep.subr.bf16.mxu1 %v4996_v62 }
  0x95   : > { %4257 = vmatmul.mubr.bf16.gmra.mrb[16].mxu1 %v5234_v63 }
  0x96   : > { %4481 = vmatmul.mubr.bf16.vlgmr.msra.gmra.mrb[0].mxu0 %v5197_v37  ;;  %4260 = vmatprep.mubr.bf16.mxu1 %v5241_v4  ;;  %v4997_v37 = vld [vmem:[%s5140_s26 + $0x1e0] sm:$0xff]  }
  0x97   : > { %4513 = vmatpush3.bf16.msra.mxu0 %v4989_v26  ;;  %4484 = vmatprep.mubr.bf16.mxu0 %v5205_v45  ;;  %v1128_v45 = vld [vmem:[#allocation2] sm:$0xfe] }
  0x98   : > { %4514 = vmatprep.subr.bf16.mxu0 %v4991_v5 }
  0x9b   : > { %4515 = vmatpush3.bf16.msra.mxu0 %v4991_v5  ;;  %v5011_v5 = vld [vmem:[%s5140_s26 + $0xf8] sm:$0xff]  }
  0x9c   : > { %4516 = vmatprep.subr.bf16.mxu0 %v4993_v25 }
  0x9d   : > { %4261 = vmatmul.mubr.bf16.gmra.mrb[20].mxu1 %v5258_v20 }
  0x9e   : > { %4485 = vmatmul.mubr.bf16.gmra.mrb[4].mxu0 %v5210_v49  ;;  %4264 = vmatprep.mubr.bf16.mxu1 %v5261_v21  ;;  %v1164_v49 = vrot.slane %v1128_v45, 1 }
  0x9f   : > { %4488 = vmatprep.mubr.bf16.mxu0 %v5222_v57  ;;  %4517 = vmatpush3.bf16.msra.mxu0 %v4993_v25  ;;  %v1165_v57 = vrot.slane %v5018_v15, 1 }
  0xa0   : > { %4518 = vmatprep.subr.bf16.mxu0 %v4995_v9 }
  0xa1   : > { %v1166_v26 = vsel %vm1163_vm1, %v1164_v49, %v1165_v57 }
  0xa3   : > { %4519 = vmatpush3.bf16.msra.mxu0 %v4995_v9 }
  0xa4   : > { %4520 = vmatprep.subr.bf16.mxu0 %v4997_v37 }
  0xa5   : > { %4265 = vmatmul.mubr.bf16.gmra.mrb[24].mxu1 %v5272_v30 }
  0xa6   : > { %4489 = vmatmul.mubr.bf16.gmra.mrb[8].mxu0 %v5234_v63  ;;  %4268 = vmatprep.mubr.bf16.mxu1 %v5277_v32  ;;  %v1167_v63 = vrot.slane %v5175_v18, 1  ;;  %v5000_v18 = vld [vmem:[%s5140_s26 + $0xd0] sm:$0xff]  }
  0xa7   : > { %4492 = vmatprep.mubr.bf16.mxu0 %v5241_v4  ;;  %4521 = vmatpush3.bf16.msra.mxu0 %v4997_v37  ;;  %v5503_v4 = vld [vmem:[%s5140_s26 + $0x200] sm:$0xff]  }
  0xa8   : > { %4522 = vmatprep.subr.bf16.mxu0 %v4999_v14  ;;  %v1168_v12 = vsel %vm1163_vm1, %v1165_v57, %v1167_v63  ;;  %v1170_v33 = vsel %vm1163_vm1, %v1167_v63, %v5295_v40  ;;  %v5522_v40 = vld [vmem:[#allocation2 + $0x28] sm:$0xff]  ;;  %v5545_v37 = vld [vmem:[#allocation2 + $0x40] sm:$0xff] }
  0xa9   : > { %v2792_v39 = vshll.u32 %v5522_v40, 16  ;;  %v2816_v49 = vshll.u32 %v5545_v37, 16  ;;  %v5008_v57 = vld [vmem:[%s5140_s26 + $0x208] sm:$0xff]  }
  0xab   : > { %4523 = vmatpush3.bf16.msra.mxu0 %v4999_v14  ;;  %v2794_v50 = vrot.slane %v2792_v39, 1 }
  0xac   : > { %4524 = vmatprep.subr.bf16.mxu0 %v5001_v22 }
  0xad   : > { %4269 = vmatmul.mubr.bf16.gmra.mrb[28].mxu1 %v5292_v38 }
  0xae   : > { %4493 = vmatmul.mubr.bf16.gmra.mrb[12].mxu0 %v5258_v20  ;;  %4288 = vmatprep.mubr.bf16.mxu1 %v1166_v26  ;;  %v5002_v20 = vld [vmem:[%s5140_s26 + $0xd8] sm:$0xff]   ;;  %v5019_v26 = vld [vmem:[%s5140_s26 + $0x100] sm:$0xff]  }
  0xaf   : > { %4496 = vmatprep.mubr.bf16.mxu0 %v5261_v21  ;;  %4525 = vmatpush3.bf16.msra.mxu0 %v5001_v22  ;;  %v5515_v21 = vld [vmem:[#allocation2 + $0x20] sm:$0xff]  ;;  %v2820_v22 = vshrl.u32 %v5545_v37, 16 }
  0xb0   : > { %4526 = vmatprep.subr.bf16.mxu0 %v5004_v31  ;;  %v2785_v58 = vshrl.u32 %v5515_v21, 16 }
  0xb3   : > { %4527 = vmatpush3.bf16.msra.mxu0 %v5004_v31  ;;  %v2818_v31 = vrot.slane %v2816_v49, 1 }
  0xb4   : > { %4560 = vmatprep.subr.bf16.mxu0 %v5503_v4 }
  0xb5   : > { %4289 = vmatmul.mubr.bf16.vlgmr.msra.gmra.mrb[0].mxu1 %v1168_v12  ;;  %v2822_v12 = vor.u32 %v2820_v22, %v2818_v31  ;;  %v1461_v22 = vld [vmem:[#allocation2 + $0x48] sm:$0xff] }
  0xb6   : > { %4497 = vmatmul.mubr.bf16.gmra.mrb[16].mxu0 %v5272_v30  ;;  %4321 = vmatpush3.bf16.msra.mxu1 %v4996_v62  ;;  %v2787_v30 = vshll.u32 %v5515_v21, 16  ;;  %v2808_v62 = vshll.u32 %v5534_v59, 16 }
  0xb7   : > { %4292 = vmatprep.mubr.bf16.mxu1 %v1170_v33  ;;  %4500 = vmatprep.mubr.bf16.mxu0 %v5277_v32  ;;  %v5005_v32 = vld [vmem:[%s5140_s26 + $0xe0] sm:$0xff]   ;;  %v5010_v33 = vld [vmem:[%s5140_s26 + $0x210] sm:$0xff]  }
  0xb8   : > { %4322 = vmatprep.subr.bf16.mxu1 %v4998_v35  ;;  %v2810_v14 = vrot.slane %v2808_v62, 1 }
  0xba   : > { %4323 = vmatpush3.bf16.msra.mxu1 %v4998_v35 }
  0xbb   : > { %4324 = vmatprep.subr.bf16.mxu1 %v5000_v18 }
  0xbd   : > { %4293 = vmatmul.mubr.bf16.gmra.mrb[4].mxu1 %v5328_v0  ;;  %v2789_v0 = vrot.slane %v2787_v30, 1  ;;  %v1454_v30 = vld [vmem:[#allocation2 + $0x10] sm:$0xff] }
  0xbe   : > { %4501 = vmatmul.mubr.bf16.gmra.mrb[20].mxu0 %v5292_v38  ;;  %4296 = vmatprep.mubr.bf16.mxu1 %v5334_v2  ;;  %v5007_v38 = vld [vmem:[%s5140_s26 + $0xe8] sm:$0xff]   ;;  %v5531_v2 = vld [vmem:[#allocation2 + $0x30] sm:$0xff] }
  0xbf   : > { %4504 = vmatprep.mubr.bf16.mxu0 %v5299_v42  ;;  %4325 = vmatpush3.bf16.msra.mxu1 %v5000_v18  ;;  %v2790_v44 = vor.u32 %v2789_v0, %v2785_v58  ;;  %v2800_v60 = vshll.u32 %v5531_v2, 16  ;;  %v2827_v18 = vsel %vm561_vm0, %v2822_v12, %v5255_v17  ;;  %v5015_v17 = vld [vmem:[%s5140_s26 + $0x230] sm:$0xff]   ;;  %v2884_v58 = vshrl.u32 %v5299_v42, 16 }
  0xc0   : > { %4326 = vmatprep.subr.bf16.mxu1 %v5002_v20  ;;  %v2888_v0 = vshll.u32 %v5337_v3, 16  ;;  %v5025_v12 = vld [vmem:[%s5140_s26 + $0x130] sm:$0xff]  }
  0xc1   : > { %v2795_v61 = vsel %vm561_vm0, %v2790_v44, %v2794_v50  ;;  %v2802_v25 = vrot.slane %v2800_v60, 1  ;;  %v2892_v44 = vshrl.u32 %v5337_v3, 16 }
  0xc2   : > { %v2890_v39 = vrot.slane %v2888_v0, 1 }
  0xc3   : > { %4327 = vmatpush3.bf16.msra.mxu1 %v5002_v20  ;;  %v5014_v20 = vld [vmem:[%s5140_s26 + $0x228] sm:$0xff]  }
  0xc4   : > { %4328 = vmatprep.subr.bf16.mxu1 %v5005_v32 }
  0xc5   : > { %4297 = vmatmul.mubr.bf16.gmra.mrb[8].mxu1 %v5357_v23  ;;  %v2796_v23 = vshrl.u32 %v5522_v40, 16 }
  0xc6   : > { %4505 = vmatmul.mubr.bf16.gmra.mrb[24].mxu0 %v5337_v3  ;;  %4300 = vmatprep.mubr.bf16.mxu1 %v5365_v28  ;;  %v2804_v28 = vshrl.u32 %v5531_v2, 16 }
  0xc7   : > { %4508 = vmatprep.mubr.bf16.mxu0 %v5344_v7  ;;  %4329 = vmatpush3.bf16.msra.mxu1 %v5005_v32  ;;  %v2798_v9 = vor.u32 %v2796_v23, %v2794_v50  ;;  %v5017_v32 = vld [vmem:[%s5140_s26 + $0x238] sm:$0xff]   ;;  %v2904_v50 = vshll.u32 %v5402_v6, 16 }
  0xc8   : > { %4330 = vmatprep.subr.bf16.mxu1 %v5007_v38  ;;  %v2806_v45 = vor.u32 %v2804_v28, %v2802_v25  ;;  %v5602_v28 = vld [vmem:[#allocation2 + $0xa0] sm:$0x1] }
  0xc9   : > { %v2803_v15 = vsel %vm561_vm0, %v2798_v9, %v2802_v25  ;;  %v2906_v23 = vrot.slane %v2904_v50, 1  ;;  %v2912_v25 = vshll.u32 %v5602_v28, 16 }
  0xcb   : > { %4331 = vmatpush3.bf16.msra.mxu1 %v5007_v38 }
  0xcc   : > { %4332 = vmatprep.subr.bf16.mxu1 %v5009_v54 }
  0xcd   : > { %4301 = vmatmul.mubr.bf16.gmra.mrb[12].mxu1 %v5380_v51  ;;  %v2812_v51 = vshrl.u32 %v5534_v59, 16 }
  0xce   : > { %4509 = vmatmul.mubr.bf16.gmra.mrb[28].mxu0 %v5402_v6  ;;  %4304 = vmatprep.mubr.bf16.mxu1 %v5386_v53  ;;  %v2811_v53 = vsel %vm561_vm0, %v2806_v45, %v2810_v14  ;;  %v5023_v45 = vld [vmem:[%s5140_s26 + $0x120] sm:$0xff]  }
  0xcf   : > { %4528 = vmatprep.mubr.bf16.mxu0 %v2795_v61  ;;  %4333 = vmatpush3.bf16.msra.mxu1 %v5009_v54  ;;  %v2814_v63 = vor.u32 %v2812_v51, %v2810_v14  ;;  %v5022_v61 = vld [vmem:[%s5140_s26 + $0x118] sm:$0xff]   ;;  %v3173_v14 = vld [vmem:[#allocation2 + $0x20] sm:$0xfe] }
  0xd0   : > { %4334 = vmatprep.subr.bf16.mxu1 %v5011_v5  ;;  %v3208_v51 = vrot.slane %v3173_v14, 1 }
  0xd1   : > { %v2819_v35 = vsel %vm561_vm0, %v2814_v63, %v2818_v31  ;;  %v1462_v31 = vld [vmem:[#allocation2 + $0x50] sm:$0xff] }
  0xd3   : > { %4335 = vmatpush3.bf16.msra.mxu1 %v5011_v5  ;;  %v2908_v5 = vshrl.u32 %v5402_v6, 16 }
  0xd4   : > { %4608 = vmatprep.subr.bf16.mxu1 %v5019_v26 }
  0xd5   : > { %4305 = vmatmul.mubr.bf16.gmra.mrb[16].mxu1 %v5411_v10  ;;  %v5012_v10 = vld [vmem:[%s5140_s26 + $0x218] sm:$0xff]   ;;  %v2910_v49 = vor.u32 %v2908_v5, %v2906_v23  ;;  %v5032_v5 = vld [vmem:[#allocation2 + $0x70] sm:$0xff] }
  0xd6   : > { %4529 = vmatmul.mubr.bf16.vlgmr.msra.gmra.mrb[0].mxu0 %v2803_v15  ;;  %4308 = vmatprep.mubr.bf16.mxu1 %v5415_v11  ;;  %v2914_v15 = vrot.slane %v2912_v25, 1  ;;  %v1858_v25 = vshll.u32 %v5032_v5, 16 }
  0xd7   : > { %4561 = vmatpush3.bf16.msra.mxu0 %v5503_v4  ;;  %4532 = vmatprep.mubr.bf16.mxu0 %v2811_v53  ;;  %v5013_v4 = vld [vmem:[%s5140_s26 + $0x220] sm:$0xff]   ;;  %v3209_v53 = vrot.slane %v5522_v40, 1 }
  0xd8   : > { %4562 = vmatprep.subr.bf16.mxu0 %v5008_v57 }
  0xd9   : > { %v3210_v63 = vsel %vm1163_vm1, %v3208_v51, %v3209_v53 }
  0xdb   : > { %4563 = vmatpush3.bf16.msra.mxu0 %v5008_v57  ;;  %v5024_v57 = vld [vmem:[%s5140_s26 + $0x128] sm:$0xff]  }
  0xdc   : > { %4564 = vmatprep.subr.bf16.mxu0 %v5010_v33 }
  0xdd   : > { %4309 = vmatmul.mubr.bf16.gmra.mrb[20].mxu1 %v5425_v27 }
  0xde   : > { %4533 = vmatmul.mubr.bf16.gmra.mrb[4].mxu0 %v2819_v35  ;;  %4312 = vmatprep.mubr.bf16.mxu1 %v5428_v29  ;;  %v5026_v35 = vld [vmem:[%s5140_s26 + $0x138] sm:$0xff]  }
  0xdf   : > { %4536 = vmatprep.mubr.bf16.mxu0 %v2827_v18  ;;  %4565 = vmatpush3.bf16.msra.mxu0 %v5010_v33  ;;  %v3211_v33 = vrot.slane %v5531_v2, 1  ;;  %v1463_v18 = vld [vmem:[#allocation2 + $0x58] sm:$0xff] }
  0xe0   : > { %4566 = vmatprep.subr.bf16.mxu0 %v5012_v10 }
  0xe3   : > { %4567 = vmatpush3.bf16.msra.mxu0 %v5012_v10  ;;  %v3212_v10 = vsel %vm1163_vm1, %v3209_v53, %v3211_v33 }
  0xe4   : > { %4568 = vmatprep.subr.bf16.mxu0 %v5013_v4 }
  0xe5   : > { %4313 = vmatmul.mubr.bf16.gmra.mrb[24].mxu1 %v5439_v34 }
  0xe6   : > { %4537 = vmatmul.mubr.bf16.gmra.mrb[8].mxu0 %v5305_v43  ;;  %4316 = vmatprep.mubr.bf16.mxu1 %v5442_v13  ;;  %v1455_v43 = vld [vmem:[#allocation2 + $0x18] sm:$0xff] }
  0xe7   : > { %4540 = vmatprep.mubr.bf16.mxu0 %v5331_v1  ;;  %4569 = vmatpush3.bf16.msra.mxu0 %v5013_v4  ;;  %v2880_v1 = vshll.u32 %v5299_v42, 16  ;;  %v2896_v42 = vshll.u32 %v5344_v7, 16  ;;  %v1464_v4 = vld [vmem:[#allocation2 + $0x60] sm:$0xff] }
  0xe8   : > { %4570 = vmatprep.subr.bf16.mxu0 %v5014_v20 }
  0xe9   : > { %v2898_v54 = vrot.slane %v2896_v42, 1 }
  0xeb   : > { %4571 = vmatpush3.bf16.msra.mxu0 %v5014_v20 }
  0xec   : > { %4572 = vmatprep.subr.bf16.mxu0 %v5015_v17 }
  0xed   : > { %4317 = vmatmul.mubr.bf16.gmra.mrb[28].mxu1 %v5405_v8 }
  0xee   : > { %4541 = vmatmul.mubr.bf16.gmra.mrb[12].mxu0 %v5353_v16  ;;  %4336 = vmatprep.mubr.bf16.mxu1 %v1454_v30  ;;  %v5579_v16 = vrot.slane %v2880_v1, 1  ;;  %v5027_v30 = vld [vmem:[#allocation2 + $0x48] sm:$0xff] }
  0xef   : > { %4544 = vmatprep.mubr.bf16.mxu0 %v5360_v24  ;;  %4573 = vmatpush3.bf16.msra.mxu0 %v5015_v17  ;;  %v5020_v24 = vld [vmem:[%s5140_s26 + $0x108] sm:$0xff]   ;;  %v3215_v17 = vrot.slane %v5545_v37, 1 }
  0xf0   : > { %4574 = vmatprep.subr.bf16.mxu0 %v5017_v32  ;;  %v2886_v8 = vor.u32 %v2884_v58, %v5579_v16  ;;  %v2883_v38 = vsel %vm561_vm0, %v5395_v56, %v5579_v16  ;;  %v5599_v56 = vor.u32 %v2892_v44, %v2890_v39  ;;  %v1467_v58 = vld [vmem:[#allocation2 + $0x78] sm:$0xff]  ;;  %v5030_v44 = vld [vmem:[#allocation2 + $0x60] sm:$0xff] }
  0xf2   : > { %v2899_v62 = vsel %vm561_vm0, %v5599_v56, %v2898_v54 }
  0xf3   : > { %4575 = vmatpush3.bf16.msra.mxu0 %v5017_v32  ;;  %v1465_v32 = vld [vmem:[#allocation2 + $0x68] sm:$0xff] }
  0xf5   : > { %4337 = vmatmul.mubr.bf16.vlgmr.msra.gmra.mrb[0].mxu1 %v1455_v43  ;;  %v1466_v43 = vld [vmem:[#allocation2 + $0x70] sm:$0xff] }
  0xf6   : > { %4545 = vmatmul.mubr.bf16.gmra.mrb[16].mxu0 %v5376_v47  ;;  %4616 = vmatpush3.bf16.msra.mxu1 %v5019_v26  ;;  %v5021_v47 = vld [vmem:[%s5140_s26 + $0x110] sm:$0xff]   ;;  %v2915_v26 = vsel %vm561_vm0, %v2910_v49, %v2914_v15  ;;  %v1862_v49 = vshrl.u32 %v5032_v5, 16  ;;  %v5033_v15 = vld [vmem:[#allocation2 + $0x78] sm:$0xff]  ;;  %s3734_s26 = sshll.u32 %s307_s23, 3 }
  0xf7   : > { %4340 = vmatprep.mubr.bf16.mxu1 %v5515_v21  ;;  %4548 = vmatprep.mubr.bf16.mxu0 %v5383_v52  ;;  %v5592_v21 = vsel %vm561_vm0, %v2886_v8, %v2890_v39  ;;  %v2900_v52 = vshrl.u32 %v5344_v7, 16  ;;  %v5028_v8 = vld [vmem:[#allocation2 + $0x50] sm:$0xff]  ;;  %v1866_v51 = vshll.u32 %v5033_v15, 16  ;;  %s5674_s16 = scalar_lea.vmem %s5762_s4, %s3734_s26 }
  0xf8   : > { %4609 = vmatprep.subr.bf16.mxu1 %v5020_v24  ;;  %v1830_v39 = vshrl.u32 %v5028_v8, 16 }
  0xf9   : > { %v2902_v60 = vor.u32 %v2900_v52, %v2898_v54  ;;  %v1842_v52 = vshll.u32 %v5030_v44, 16  ;;  %v1868_v53 = vrot.slane %v1866_v51, 1 }
  0xfa   : > { %4617 = vmatpush3.bf16.msra.mxu1 %v5020_v24  ;;  %v1468_v24 = vld [vmem:[#allocation2 + $0x80] sm:$0xff] }
  0xfb   : > { %4610 = vmatprep.subr.bf16.mxu1 %v5021_v47  ;;  %v2907_v9 = vsel %vm561_vm0, %v2902_v60, %v2906_v23  ;;  %v1846_v60 = vshrl.u32 %v5030_v44, 16 }
  0xfd   : > { %4341 = vmatmul.mubr.bf16.gmra.mrb[4].mxu1 %v5522_v40  ;;  %v3213_v40 = vrot.slane %v5534_v59, 1 }
  0xfe   : > { %4549 = vmatmul.mubr.bf16.gmra.mrb[20].mxu0 %v2883_v38  ;;  %4344 = vmatprep.mubr.bf16.mxu1 %v5531_v2  ;;  %v3217_v2 = vrot.slane %v5027_v30, 1  ;;  %v1832_v38 = vor.u32 %v1830_v39, %v5289_v36 }
  0xff   : > { %4552 = vmatprep.mubr.bf16.mxu0 %v5592_v21  ;;  %4618 = vmatpush3.bf16.msra.mxu1 %v5021_v47  ;;  %v3214_v20 = vsel %vm1163_vm1, %v3211_v33, %v3213_v40 }
 0x100   : > { %4611 = vmatprep.subr.bf16.mxu1 %v5022_v61  ;;  %v3218_v1 = vsel %vm1163_vm1, %v3215_v17, %v3217_v2  ;;  %v3220_v0 = vsel %vm1163_vm1, %v3217_v2, %v5391_v55  ;;  %v5031_v55 = vld [vmem:[#allocation2 + $0x68] sm:$0xff] }
 0x101   : > { %v1850_v23 = vshll.u32 %v5031_v55, 16 }
 0x103   : > { %4619 = vmatpush3.bf16.msra.mxu1 %v5022_v61  ;;  %v1844_v61 = vrot.slane %v1842_v52, 1  ;;  %v1852_v36 = vrot.slane %v1850_v23, 1 }
 0x104   : > { %4612 = vmatprep.subr.bf16.mxu1 %v5023_v45 }
 0x105   : > { %4345 = vmatmul.mubr.bf16.gmra.mrb[8].mxu1 %v5534_v59  ;;  %v3216_v59 = vsel %vm1163_vm1, %v3213_v40, %v3215_v17 }
 0x106   : > { %4553 = vmatmul.mubr.bf16.gmra.mrb[24].mxu0 %v2899_v62  ;;  %4348 = vmatprep.mubr.bf16.mxu1 %v5545_v37  ;;  %v5029_v37 = vld [vmem:[#allocation2 + $0x58] sm:$0xff] }
 0x107   : > { %4556 = vmatprep.mubr.bf16.mxu0 %v2907_v9  ;;  %4620 = vmatpush3.bf16.msra.mxu1 %v5023_v45  ;;  %v1834_v42 = vshll.u32 %v5029_v37, 16  ;;  %v1838_v50 = vshrl.u32 %v5029_v37, 16  ;;  %v1854_v45 = vshrl.u32 %v5031_v55, 16 }
 0x108   : > { %4613 = vmatprep.subr.bf16.mxu1 %v5024_v57 }
 0x109   : > { %v1836_v47 = vrot.slane %v1834_v42, 1 }
 0x10b   : > { %4621 = vmatpush3.bf16.msra.mxu1 %v5024_v57  ;;  %v1837_v54 = vsel %vm561_vm0, %v1832_v38, %v1836_v47  ;;  %v1840_v62 = vor.u32 %v1838_v50, %v1836_v47 }
 0x10c   : > { %4614 = vmatprep.subr.bf16.mxu1 %v5025_v12 }
 0x10d   : > { %4349 = vmatmul.mubr.bf16.gmra.mrb[12].mxu1 %v1461_v22  ;;  %v1845_v9 = vsel %vm561_vm0, %v1840_v62, %v1844_v61  ;;  %v1870_v22 = vshrl.u32 %v5033_v15, 16 }
 0x10e   : > { %4557 = vmatmul.mubr.bf16.gmra.mrb[28].mxu0 %v2915_v26  ;;  %4352 = vmatprep.mubr.bf16.mxu1 %v1462_v31 }
 0x10f   : > { %4576 = vmatprep.mubr.bf16.mxu0 %v3210_v63  ;;  %4622 = vmatpush3.bf16.msra.mxu1 %v5025_v12  ;;  %v1872_v31 = vor.u32 %v1870_v22, %v1868_v53  ;;  %v3237_v63 = vrot.slane %v5402_v6, 1  ;;  %v1890_v12 = vshll.u32 %v5462_v48, 16 }
 0x110   : > { %4615 = vmatprep.subr.bf16.mxu1 %v5026_v35 }
 0x113   : > { %4623 = vmatpush3.bf16.msra.mxu1 %v5026_v35 }
 0x115   : > { %4353 = vmatmul.mubr.bf16.gmra.mrb[16].mxu1 %v1463_v18 }
 0x116   : > { %4577 = vmatmul.mubr.bf16.vlgmr.msra.gmra.mrb[0].mxu0 %v3212_v10  ;;  %4356 = vmatprep.mubr.bf16.mxu1 %v1464_v4 }
 0x117   : > { %4580 = vmatprep.mubr.bf16.mxu0 %v3214_v20 }
 0x11d   : > { %4357 = vmatmul.mubr.bf16.gmra.mrb[20].mxu1 %v1465_v32 }
 0x11e   : > { %4581 = vmatmul.mubr.bf16.gmra.mrb[4].mxu0 %v3216_v59  ;;  %4360 = vmatprep.mubr.bf16.mxu1 %v1466_v43  ;;  %v5668_v43 = vld [vmem:[%s5761_s3] ss:$0 sm:$0xff] }
 0x11f   : > { %4584 = vmatprep.mubr.bf16.mxu0 %v3218_v1 }
 0x125   : > { %4361 = vmatmul.mubr.bf16.gmra.mrb[24].mxu1 %v1467_v58 }
 0x126   : > { %4585 = vmatmul.mubr.bf16.gmra.mrb[8].mxu0 %v3220_v0  ;;  %4364 = vmatprep.mubr.bf16.mxu1 %v1468_v24 }
 0x127   : > { %4588 = vmatprep.mubr.bf16.mxu0 %v5415_v11  ;;  %v1848_v11 = vor.u32 %v1846_v60, %v1844_v61 }
 0x129   : > { %v1853_v14 = vsel %vm561_vm0, %v1848_v11, %v1852_v36 }
 0x12d   : > { %4365 = vmatmul.mubr.bf16.gmra.mrb[28].mxu1 %v5337_v3  ;;  %v1860_v3 = vrot.slane %v1858_v25, 1 }
 0x12e   : > { %4589 = vmatmul.mubr.bf16.gmra.mrb[12].mxu0 %v5425_v27  ;;  %4400 = vmatprep.mubr.bf16.mxu1 %v1837_v54  ;;  %v1856_v27 = vor.u32 %v1854_v45, %v1852_v36 }
 0x12f   : > { %4592 = vmatprep.mubr.bf16.mxu0 %v5428_v29  ;;  %v1864_v29 = vor.u32 %v1862_v49, %v1860_v3 }
 0x130   : > { %v1861_v57 = vsel %vm561_vm0, %v1856_v27, %v1860_v3 }
 0x131   : > { %v1869_v26 = vsel %vm561_vm0, %v1864_v29, %v1868_v53 }
 0x135   : > { %4401 = vmatmul.mubr.bf16.vlgmr.msra.gmra.mrb[16].mxu1 %v1845_v9 }
 0x136   : > { %4593 = vmatmul.mubr.bf16.gmra.mrb[16].mxu0 %v5439_v34  ;;  %4404 = vmatprep.mubr.bf16.mxu1 %v1853_v14  ;;  %v3235_v34 = vrot.slane %v5344_v7, 1  ;;  %v3239_v7 = vrot.slane %v5602_v28, 1 }
 0x137   : > { %4596 = vmatprep.mubr.bf16.mxu0 %v5442_v13  ;;  %v1877_v13 = vsel %vm561_vm0, %v1872_v31, %v5579_v16 }
 0x138   : > { %v3236_v33 = vsel %vm1163_vm1, %v5452_v41, %v3235_v34  ;;  %v3238_v40 = vsel %vm1163_vm1, %v3235_v34, %v3237_v63 }
 0x13d   : > { %4405 = vmatmul.mubr.bf16.gmra.mrb[20].mxu1 %v1861_v57 }
 0x13e   : > { %4597 = vmatmul.mubr.bf16.gmra.mrb[20].mxu0 %v5456_v19  ;;  %4408 = vmatprep.mubr.bf16.mxu1 %v1869_v26  ;;  %v1892_v19 = vrot.slane %v1890_v12, 1 }
 0x13f   : > { %4600 = vmatprep.mubr.bf16.mxu0 %v5460_v46  ;;  %v3240_v46 = vsel %vm1163_vm1, %v3237_v63, %v3239_v7 }
 0x140   : > { %v1893_v6 = vsel %vm561_vm0, %v5599_v56, %v1892_v19 }
 0x145   : > { %4409 = vmatmul.mubr.bf16.gmra.mrb[24].mxu1 %v1877_v13 }
 0x146   : > { %4601 = vmatmul.mubr.bf16.gmra.mrb[24].mxu0 %v3236_v33  ;;  %4412 = vmatprep.mubr.bf16.mxu1 %v5592_v21 }
 0x147   : > { %4604 = vmatprep.mubr.bf16.mxu0 %v3238_v40 }
 0x14d   : > { %4413 = vmatmul.mubr.bf16.gmra.mrb[28].mxu1 %v1893_v6 }
 0x14e   : > { %4605 = vmatmul.mubr.bf16.gmra.mrb[28].mxu0 %v3240_v46 }
 0x1c8   : > { %v4338_v48 = vpop.f32.mrb[0].mxu1 }
 0x1c9   : > { %v1569_v41 = vpop.f32.mrb[1].mxu1 }
 0x1ca   : > { %v4339_v16 = vpop.f32.mrb[2].mxu1 }
 0x1cb   : > { %v1572_v35 = vpop.f32.mrb[3].mxu1 }
 0x1d0   : > { %v4342_v18 = vpop.f32.mrb[4].mxu1 }
 0x1d1   : > { %v1585_v21 = vpop.f32.mrb[5].mxu1 }
 0x1d2   : > { %v4343_v10 = vpop.f32.mrb[6].mxu1 }
 0x1d3   : > { %v1588_v4 = vpop.f32.mrb[7].mxu1 }
 0x1d8   : > { %v4346_v20 = vpop.f32.mrb[8].mxu1 }
 0x1d9   : > { %v1601_v28 = vpop.f32.mrb[9].mxu1 }
 0x1da   : > { %v4347_v17 = vpop.f32.mrb[10].mxu1 }
 0x1db   : > { %v1604_v30 = vpop.f32.mrb[11].mxu1 }
 0x1e0   : > { %v5655_v56 = vpop.f32.mrb[12].mxu1 }
 0x1e1   : > { %v5657_v2 = vpop.f32.mrb[13].mxu1 }
 0x1e2   : > { %v5659_v32 = vpop.f32.mrb[14].mxu1 }
 0x1e3   : > { %v5661_v59 = vpop.f32.mrb[15].mxu1 }
 0x1e9   : > { %v4578_v1 = vpop.f32.mrb[0].mxu0 }
 0x1ea   : > { %v4624_v58 = vadd.f32 %v4578_v1, %v4338_v48  ;;  %v3339_v0 = vpop.f32.mrb[1].mxu0 }
 0x1eb   : > { %v4625_v24 = vadd.f32 %v3339_v0, %v1569_v41  ;;  %v4579_v8 = vpop.f32.mrb[2].mxu0 }
 0x1ec   : > { %v3506_v39 = vadd.f32 %v4624_v58, %v5668_v43  ;;  %v4626_v37 = vadd.f32 %v4579_v8, %v4339_v16  ;;  %v3342_v42 = vpop.f32.mrb[3].mxu0 }
 0x1ed   : > { %v3504_v38 = vadd.f32 %v4625_v24, %v5668_v43  ;;  %v4627_v47 = vadd.f32 %v3342_v42, %v1572_v35 }
 0x1ee   : > { %v3538_v44 = vmax.f32 %v3506_v39, 0.0  ;;  %v3507_v52 = vadd.f32 %v4626_v37, %v5668_v43 }
 0x1ef   : > { %v3536_v50 = vmax.f32 %v3504_v38, 0.0  ;;  %v3505_v54 = vadd.f32 %v4627_v47, %v5668_v43 }
 0x1f0   : > { %3570 = vst [vmem:[%s5674_s16 + $0x10] sm:$0xff] %v3538_v44  ;;  %v3539_v60 = vmax.f32 %v3507_v52, 0.0 }
 0x1f1   : > { %3568 = vst [vmem:[%s5674_s16] sm:$0xff] %v3536_v50  ;;  %v3537_v55 = vmax.f32 %v3505_v54, 0.0  ;;  %v4582_v23 = vpop.f32.mrb[4].mxu0 }
 0x1f2   : > { %3571 = vst [vmem:[%s5674_s16 + $0x18] sm:$0xff] %v3539_v60  ;;  %v4628_v61 = vadd.f32 %v4582_v23, %v4342_v18  ;;  %v3355_v62 = vpop.f32.mrb[5].mxu0 }
 0x1f3   : > { %3569 = vst [vmem:[%s5674_s16 + $0x8] sm:$0xff] %v3537_v55  ;;  %v4629_v11 = vadd.f32 %v3355_v62, %v1585_v21  ;;  %v4583_v36 = vpop.f32.mrb[6].mxu0 }
 0x1f4   : > { %v3510_v5 = vadd.f32 %v4628_v61, %v5668_v43  ;;  %v4630_v25 = vadd.f32 %v4583_v36, %v4343_v10  ;;  %v3358_v9 = vpop.f32.mrb[7].mxu0 }
 0x1f5   : > { %v3508_v45 = vadd.f32 %v4629_v11, %v5668_v43  ;;  %v4631_v14 = vadd.f32 %v3358_v9, %v1588_v4 }
 0x1f6   : > { %v3542_v49 = vmax.f32 %v3510_v5, 0.0  ;;  %v3511_v15 = vadd.f32 %v4630_v25, %v5668_v43 }
 0x1f7   : > { %v3540_v51 = vmax.f32 %v3508_v45, 0.0  ;;  %v3509_v3 = vadd.f32 %v4631_v14, %v5668_v43 }
 0x1f8   : > { %3574 = vst [vmem:[%s5674_s16 + $0x30] sm:$0xff] %v3542_v49  ;;  %v3543_v27 = vmax.f32 %v3511_v15, 0.0 }
 0x1f9   : > { %3572 = vst [vmem:[%s5674_s16 + $0x20] sm:$0xff] %v3540_v51  ;;  %v3541_v29 = vmax.f32 %v3509_v3, 0.0  ;;  %v4586_v53 = vpop.f32.mrb[8].mxu0 }
 0x1fa   : > { %3575 = vst [vmem:[%s5674_s16 + $0x38] sm:$0xff] %v3543_v27  ;;  %v4632_v57 = vadd.f32 %v4586_v53, %v4346_v20  ;;  %v3371_v22 = vpop.f32.mrb[9].mxu0 }
 0x1fb   : > { %3573 = vst [vmem:[%s5674_s16 + $0x28] sm:$0xff] %v3541_v29  ;;  %v4633_v26 = vadd.f32 %v3371_v22, %v1601_v28  ;;  %v4587_v31 = vpop.f32.mrb[10].mxu0 }
 0x1fc   : > { %v3514_v34 = vadd.f32 %v4632_v57, %v5668_v43  ;;  %v4634_v63 = vadd.f32 %v4587_v31, %v4347_v17  ;;  %v3374_v13 = vpop.f32.mrb[11].mxu0 }
 0x1fd   : > { %v3512_v12 = vadd.f32 %v4633_v26, %v5668_v43  ;;  %v4635_v33 = vadd.f32 %v3374_v13, %v1604_v30 }
 0x1fe   : > { %v3546_v40 = vmax.f32 %v3514_v34, 0.0  ;;  %v3515_v19 = vadd.f32 %v4634_v63, %v5668_v43 }
 0x1ff   : > { %v3544_v7 = vmax.f32 %v3512_v12, 0.0  ;;  %v3513_v6 = vadd.f32 %v4635_v33, %v5668_v43 }
 0x200   : > { %3578 = vst [vmem:[%s5674_s16 + $0x50] sm:$0xff] %v3546_v40  ;;  %v3547_v46 = vmax.f32 %v3515_v19, 0.0 }
 0x201   : > { %3576 = vst [vmem:[%s5674_s16 + $0x40] sm:$0xff] %v3544_v7  ;;  %v3545_v48 = vmax.f32 %v3513_v6, 0.0  ;;  %v4590_v41 = vpop.f32.mrb[12].mxu0 }
 0x202   : > { %3579 = vst [vmem:[%s5674_s16 + $0x58] sm:$0xff] %v3547_v46  ;;  %v4636_v16 = vadd.f32 %v4590_v41, %v5655_v56  ;;  %v3387_v35 = vpop.f32.mrb[13].mxu0 }
 0x203   : > { %3577 = vst [vmem:[%s5674_s16 + $0x48] sm:$0xff] %v3545_v48  ;;  %v4637_v18 = vadd.f32 %v3387_v35, %v5657_v2  ;;  %v4591_v21 = vpop.f32.mrb[14].mxu0 }
 0x204   : > { %v3518_v10 = vadd.f32 %v4636_v16, %v5668_v43  ;;  %v4638_v4 = vadd.f32 %v4591_v21, %v5659_v32  ;;  %v3390_v20 = vpop.f32.mrb[15].mxu0 }
 0x205   : > { %v3516_v28 = vadd.f32 %v4637_v18, %v5668_v43  ;;  %v4639_v17 = vadd.f32 %v3390_v20, %v5661_v59 }
 0x206   : > { %v3550_v30 = vmax.f32 %v3518_v10, 0.0  ;;  %v3519_v56 = vadd.f32 %v4638_v4, %v5668_v43 }
 0x207   : > { %v3548_v1 = vmax.f32 %v3516_v28, 0.0  ;;  %v3517_v58 = vadd.f32 %v4639_v17, %v5668_v43 }
 0x208   : > { %3582 = vst [vmem:[%s5674_s16 + $0x70] sm:$0xff] %v3550_v30  ;;  %v3551_v2 = vmax.f32 %v3519_v56, 0.0  ;;  %v4402_v0 = vpop.f32.mrb[16].mxu1 }
 0x209   : > { %3580 = vst [vmem:[%s5674_s16 + $0x60] sm:$0xff] %v3548_v1  ;;  %v3549_v24 = vmax.f32 %v3517_v58, 0.0  ;;  %v4594_v8 = vpop.f32.mrb[16].mxu0  ;;  %v2056_v39 = vpop.f32.mrb[17].mxu1 }
 0x20a   : > { %3583 = vst [vmem:[%s5674_s16 + $0x78] sm:$0xff] %v3551_v2  ;;  %v4640_v32 = vadd.f32 %v4594_v8, %v4402_v0  ;;  %v3403_v37 = vpop.f32.mrb[17].mxu0  ;;  %v4403_v42 = vpop.f32.mrb[18].mxu1 }
 0x20b   : > { %3581 = vst [vmem:[%s5674_s16 + $0x68] sm:$0xff] %v3549_v24  ;;  %v4641_v59 = vadd.f32 %v3403_v37, %v2056_v39  ;;  %v4595_v38 = vpop.f32.mrb[18].mxu0  ;;  %v2059_v47 = vpop.f32.mrb[19].mxu1 }
 0x20c   : > { %v3522_v44 = vadd.f32 %v4640_v32, %v5668_v43  ;;  %v4642_v52 = vadd.f32 %v4595_v38, %v4403_v42  ;;  %v3406_v50 = vpop.f32.mrb[19].mxu0 }
 0x20d   : > { %v3520_v54 = vadd.f32 %v4641_v59, %v5668_v43  ;;  %v4643_v60 = vadd.f32 %v3406_v50, %v2059_v47 }
 0x20e   : > { %v3554_v55 = vmax.f32 %v3522_v44, 0.0  ;;  %v3523_v23 = vadd.f32 %v4642_v52, %v5668_v43 }
 0x20f   : > { %v3552_v61 = vmax.f32 %v3520_v54, 0.0  ;;  %v3521_v62 = vadd.f32 %v4643_v60, %v5668_v43 }
 0x210   : > { %3586 = vst [vmem:[%s5674_s16 + $0x90] sm:$0xff] %v3554_v55  ;;  %v3555_v11 = vmax.f32 %v3523_v23, 0.0  ;;  %v4406_v36 = vpop.f32.mrb[20].mxu1 }
 0x211   : > { %3584 = vst [vmem:[%s5674_s16 + $0x80] sm:$0xff] %v3552_v61  ;;  %v3553_v5 = vmax.f32 %v3521_v62, 0.0  ;;  %v4598_v25 = vpop.f32.mrb[20].mxu0  ;;  %v2072_v9 = vpop.f32.mrb[21].mxu1 }
 0x212   : > { %3587 = vst [vmem:[%s5674_s16 + $0x98] sm:$0xff] %v3555_v11  ;;  %v4644_v45 = vadd.f32 %v4598_v25, %v4406_v36  ;;  %v3419_v14 = vpop.f32.mrb[21].mxu0  ;;  %v4407_v49 = vpop.f32.mrb[22].mxu1 }
 0x213   : > { %3585 = vst [vmem:[%s5674_s16 + $0x88] sm:$0xff] %v3553_v5  ;;  %v4645_v15 = vadd.f32 %v3419_v14, %v2072_v9  ;;  %v4599_v51 = vpop.f32.mrb[22].mxu0  ;;  %v2075_v3 = vpop.f32.mrb[23].mxu1 }
 0x214   : > { %v3526_v27 = vadd.f32 %v4644_v45, %v5668_v43  ;;  %v4646_v29 = vadd.f32 %v4599_v51, %v4407_v49  ;;  %v3422_v53 = vpop.f32.mrb[23].mxu0 }
 0x215   : > { %v3524_v57 = vadd.f32 %v4645_v15, %v5668_v43  ;;  %v4647_v22 = vadd.f32 %v3422_v53, %v2075_v3 }
 0x216   : > { %v3558_v26 = vmax.f32 %v3526_v27, 0.0  ;;  %v3527_v31 = vadd.f32 %v4646_v29, %v5668_v43 }
 0x217   : > { %v3556_v34 = vmax.f32 %v3524_v57, 0.0  ;;  %v3525_v63 = vadd.f32 %v4647_v22, %v5668_v43 }
 0x218   : > { %3590 = vst [vmem:[%s5674_s16 + $0xb0] sm:$0xff] %v3558_v26  ;;  %v3559_v13 = vmax.f32 %v3527_v31, 0.0  ;;  %v4410_v12 = vpop.f32.mrb[24].mxu1 }
 0x219   : > { %3588 = vst [vmem:[%s5674_s16 + $0xa0] sm:$0xff] %v3556_v34  ;;  %v3557_v33 = vmax.f32 %v3525_v63, 0.0  ;;  %v4602_v40 = vpop.f32.mrb[24].mxu0  ;;  %v2088_v19 = vpop.f32.mrb[25].mxu1 }
 0x21a   : > { %3591 = vst [vmem:[%s5674_s16 + $0xb8] sm:$0xff] %v3559_v13  ;;  %v4648_v7 = vadd.f32 %v4602_v40, %v4410_v12  ;;  %v3435_v6 = vpop.f32.mrb[25].mxu0  ;;  %v4411_v46 = vpop.f32.mrb[26].mxu1 }
 0x21b   : > { %3589 = vst [vmem:[%s5674_s16 + $0xa8] sm:$0xff] %v3557_v33  ;;  %v4649_v48 = vadd.f32 %v3435_v6, %v2088_v19  ;;  %v4603_v41 = vpop.f32.mrb[26].mxu0  ;;  %v2091_v16 = vpop.f32.mrb[27].mxu1 }
 0x21c   : > { %v3530_v35 = vadd.f32 %v4648_v7, %v5668_v43  ;;  %v4650_v18 = vadd.f32 %v4603_v41, %v4411_v46  ;;  %v3438_v21 = vpop.f32.mrb[27].mxu0 }
 0x21d   : > { %v3528_v10 = vadd.f32 %v4649_v48, %v5668_v43  ;;  %v4651_v4 = vadd.f32 %v3438_v21, %v2091_v16 }
 0x21e   : > { %v3562_v20 = vmax.f32 %v3530_v35, 0.0  ;;  %v3531_v28 = vadd.f32 %v4650_v18, %v5668_v43 }
 0x21f   : > { %v3560_v17 = vmax.f32 %v3528_v10, 0.0  ;;  %v3529_v30 = vadd.f32 %v4651_v4, %v5668_v43 }
 0x220   : > { %3594 = vst [vmem:[%s5674_s16 + $0xd0] sm:$0xff] %v3562_v20  ;;  %v3563_v56 = vmax.f32 %v3531_v28, 0.0  ;;  %v4414_v1 = vpop.f32.mrb[28].mxu1 }
 0x221   : > { %3592 = vst [vmem:[%s5674_s16 + $0xc0] sm:$0xff] %v3560_v17  ;;  %v3561_v58 = vmax.f32 %v3529_v30, 0.0  ;;  %v4606_v2 = vpop.f32.mrb[28].mxu0  ;;  %v2104_v0 = vpop.f32.mrb[29].mxu1 }
 0x222   : > { %3595 = vst [vmem:[%s5674_s16 + $0xd8] sm:$0xff] %v3563_v56  ;;  %v4652_v24 = vadd.f32 %v4606_v2, %v4414_v1  ;;  %v3451_v8 = vpop.f32.mrb[29].mxu0  ;;  %v4415_v39 = vpop.f32.mrb[30].mxu1 }
 0x223   : > { %3593 = vst [vmem:[%s5674_s16 + $0xc8] sm:$0xff] %v3561_v58  ;;  %v4653_v32 = vadd.f32 %v3451_v8, %v2104_v0  ;;  %v4607_v37 = vpop.f32.mrb[30].mxu0  ;;  %v2107_v42 = vpop.f32.mrb[31].mxu1 }
 0x224   : > { %v3534_v59 = vadd.f32 %v4652_v24, %v5668_v43  ;;  %v4654_v38 = vadd.f32 %v4607_v37, %v4415_v39  ;;  %v3454_v47 = vpop.f32.mrb[31].mxu0 }
 0x225   : > { %v3532_v44 = vadd.f32 %v4653_v32, %v5668_v43  ;;  %v4655_v52 = vadd.f32 %v3454_v47, %v2107_v42 }
 0x226   : > { %v3566_v50 = vmax.f32 %v3534_v59, 0.0  ;;  %v3535_v54 = vadd.f32 %v4654_v38, %v5668_v43 }
 0x227   : > { %v3564_v60 = vmax.f32 %v3532_v44, 0.0  ;;  %v3533_v55 = vadd.f32 %v4655_v52, %v5668_v43 }
 0x228   : > { %3598 = vst [vmem:[%s5674_s16 + $0xf0] sm:$0xff] %v3566_v50  ;;  %v3567_v23 = vmax.f32 %v3535_v54, 0.0 }
 0x229   : > { %3596 = vst [vmem:[%s5674_s16 + $0xe0] sm:$0xff] %v3564_v60  ;;  %v3565_v61 = vmax.f32 %v3533_v55, 0.0 }
 0x22a   : > { %3599 = vst [vmem:[%s5674_s16 + $0xf8] sm:$0xff] %v3567_v23 }
 0x22b   : > { %3597 = vst [vmem:[%s5674_s16 + $0xe8] sm:$0xff] %v3565_v61 }
 0x22c PF: > { %s14_s19 = sadd.s32 1, %s5072_s19   ;;  %s5763_s15 = smov %s5064_s17 }
 0x22d   : > { %p11_p9 = scmp.ge.s32.totalorder %s14_s19, 6   ;;  %s5764_s16 = smov %s5068_s18 }
 0x22e   : > { %s5765_s17 = smov %s5768_s20  ;;  %s5766_s18 = smov %s5772_s21 }
 0x22f   :  { %13 = sbr.rel (!%p11_p9) target bundleno = 3 (0x3), region = 80 }

</bundles_post_ra>
